<compile_context>
chip_gen: v6e
topology: v6e:2x2x1
jax: 0.10.0
libtpu: 0.0.40
codegen_flags: <defaults>
</compile_context>

<pallas_src>
import functools
import math

import jax
import jax.numpy as jnp
from jax.experimental import pallas as pl
from jax.experimental.pallas import tpu as pltpu

_LANE = 128


def _round_up(x, m):
    return ((x + m - 1) // m) * m


def sage_layer_kernel(
    a_ref,      # (TM, TK)        bf16  normalized-adjacency tile (streamed)
    x_ref,      # (N_pad, F_in)   bf16  full X, VMEM-resident (constant index_map)
    wl_ref,     # (F_in, F_out)   bf16  neighbor (lin_l) weight, resident
    wr_ref,     # (F_in, F_out)   bf16  root (lin_r) weight, resident
    b_ref,      # (1, F_out)      f32   lin_l bias, resident
    drop_ref,   # (TM, F_out)     f32   dropout scale mask (0 or 1/keep_prob)
    out_ref,    # (TM, F_out)     bf16 (hidden layers) / f32 (final layer)
    acc_ref,    # (TM, F_in)      f32   mean-aggregation accumulator (scratch)
    *,
    tm,
    tk,
    k_last,
    out_valid,
    apply_log_softmax,
):
    # NOTE: keep every pl.program_id call at the TOP LEVEL of the kernel body
    # (never inside a pl.when closure); the closures below only capture the
    # already-materialized int32 values i / k.
    i = pl.program_id(0)
    k = pl.program_id(1)

    @pl.when(k == 0)
    def _zero_acc():
        acc_ref[...] = jnp.zeros_like(acc_ref)

    # agg += A[i, k] @ X[k]   (bf16 MXU operands, f32 accumulate)
    x_k = x_ref[pl.ds(k * tk, tk), :]
    acc_ref[...] += jnp.dot(a_ref[...], x_k, preferred_element_type=jnp.float32)

    @pl.when(k == k_last)
    def _epilogue():
        x_i = x_ref[pl.ds(i * tm, tm), :]            # root (self) rows
        h = (
            jnp.dot(acc_ref[...].astype(jnp.bfloat16), wl_ref[...],
                    preferred_element_type=jnp.float32)
            + jnp.dot(x_i, wr_ref[...], preferred_element_type=jnp.float32)
            + b_ref[...]
        )

        # ELU (f32 epilogue math; exp goes to the EUP slot).  exp(x)-1 instead
        # of expm1 for guaranteed Mosaic lowering.
        h = jnp.where(h > 0.0, h, jnp.exp(jnp.minimum(h, 0.0)) - 1.0)

        # Dropout (F.dropout training=True semantics) via precomputed scale mask.
        h = h * drop_ref[...]

        if apply_log_softmax:
            # Mask padded class columns out of the softmax.
            col = jax.lax.broadcasted_iota(jnp.int32, h.shape, 1)
            h = jnp.where(col < out_valid, h, jnp.float32(-1e30))
            m = jnp.max(h, axis=-1, keepdims=True)
            s = h - m
            lse = jnp.log(jnp.sum(jnp.exp(s), axis=-1, keepdims=True))
            h = s - lse

        out_ref[...] = h.astype(out_ref.dtype)


def sage_layer(
    a_bf16, x_bf16, w_l, w_r, bias, drop_mask, *,
    out_dim_pad, out_valid, final, out_dtype, tm, tk, vmem_limit_bytes,
):
    n_pad = a_bf16.shape[0]
    f_in = x_bf16.shape[1]
    grid = (n_pad // tm, n_pad // tk)

    kernel = functools.partial(
        sage_layer_kernel,
        tm=tm,
        tk=tk,
        k_last=grid[1] - 1,
        out_valid=out_valid,
        apply_log_softmax=final,
    )

    return pl.pallas_call(
        kernel,
        out_shape=jax.ShapeDtypeStruct((n_pad, out_dim_pad), out_dtype),
        grid=grid,
        in_specs=[
            pl.BlockSpec((tm, tk), lambda i, k: (i, k)),              # A tile (streamed)
            pl.BlockSpec((n_pad, f_in), lambda i, k: (0, 0)),         # X (VMEM-resident)
            pl.BlockSpec((f_in, out_dim_pad), lambda i, k: (0, 0)),   # W_l (resident)
            pl.BlockSpec((f_in, out_dim_pad), lambda i, k: (0, 0)),   # W_r (resident)
            pl.BlockSpec((1, out_dim_pad), lambda i, k: (0, 0)),      # bias (resident)
            pl.BlockSpec((tm, out_dim_pad), lambda i, k: (i, 0)),     # dropout mask
        ],
        out_specs=pl.BlockSpec((tm, out_dim_pad), lambda i, k: (i, 0)),
        scratch_shapes=[pltpu.VMEM((tm, f_in), jnp.float32)],
        compiler_params=pltpu.CompilerParams(
            dimension_semantics=("parallel", "arbitrary"),
            vmem_limit_bytes=vmem_limit_bytes,
        ),
    )(a_bf16, x_bf16, w_l, w_r, bias, drop_mask)


def graphsage_forward(
    a_norm, x, params, *, dropout_p=0.2, rng_key=None,
    tm=256, tk=512, vmem_limit_bytes=32 * 1024 * 1024,
):
    """Full 3-layer GraphSAGE forward. Returns log-probabilities [N, num_classes]."""
    (w1l, w1r, b1, w2l, w2r, b2, w3l, w3r, b3) = params
    n, in_dim = x.shape
    hid = w1l.shape[1]
    out_dim = w3l.shape[1]

    # Keep tk an integer multiple of tm (or equal) so the lcm-based row padding
    # of the dense N_pad x N_pad adjacency stays minimal.
    n_pad = _round_up(n, math.lcm(tm, tk))
    f_in_p = _round_up(in_dim, _LANE)
    hid_p = _round_up(hid, _LANE)
    out_p = _round_up(out_dim, _LANE)

    # bf16 operands for the HBM/MXU-dominant A @ H stream.
    a_p = jnp.zeros((n_pad, n_pad), jnp.bfloat16).at[:n, :n].set(
        a_norm.astype(jnp.bfloat16))
    x_p = jnp.zeros((n_pad, f_in_p), jnp.bfloat16).at[:n, :in_dim].set(
        x.astype(jnp.bfloat16))

    def pad_w(w, fi, fip, fo, fop):
        return jnp.zeros((fip, fop), jnp.bfloat16).at[:fi, :fo].set(
            w.astype(jnp.bfloat16))

    def pad_b(b, fo, fop):
        return jnp.zeros((1, fop), jnp.float32).at[:, :fo].set(
            b.reshape(1, -1).astype(jnp.float32))

    w1l_p = pad_w(w1l, in_dim, f_in_p, hid, hid_p)
    w1r_p = pad_w(w1r, in_dim, f_in_p, hid, hid_p)
    w2l_p = pad_w(w2l, hid, hid_p, hid, hid_p)
    w2r_p = pad_w(w2r, hid, hid_p, hid, hid_p)
    w3l_p = pad_w(w3l, hid, hid_p, out_dim, out_p)
    w3r_p = pad_w(w3r, hid, hid_p, out_dim, out_p)
    bb1 = pad_b(b1, hid, hid_p)
    bb2 = pad_b(b2, hid, hid_p)
    bb3 = pad_b(b3, out_dim, out_p)

    # Host-side dropout scale masks (0 or 1/keep_prob); F.dropout(training=True).
    keep_prob = 1.0 - float(dropout_p)
    if rng_key is None:
        rng_key = jax.random.PRNGKey(0)
    mk1, mk2, mk3 = jax.random.split(rng_key, 3)

    def drop_mask(key, shape):
        if keep_prob >= 1.0:
            return jnp.ones(shape, jnp.float32)
        if keep_prob <= 0.0:
            return jnp.zeros(shape, jnp.float32)
        keep = jax.random.bernoulli(key, p=keep_prob, shape=shape)
        return keep.astype(jnp.float32) * jnp.float32(1.0 / keep_prob)

    m1 = drop_mask(mk1, (n_pad, hid_p))
    m2 = drop_mask(mk2, (n_pad, hid_p))
    m3 = drop_mask(mk3, (n_pad, out_p))

    h1 = sage_layer(a_p, x_p, w1l_p, w1r_p, bb1, m1,
                    out_dim_pad=hid_p, out_valid=hid, final=False,
                    out_dtype=jnp.bfloat16, tm=tm, tk=tk,
                    vmem_limit_bytes=vmem_limit_bytes)
    h2 = sage_layer(a_p, h1, w2l_p, w2r_p, bb2, m2,
                    out_dim_pad=hid_p, out_valid=hid, final=False,
                    out_dtype=jnp.bfloat16, tm=tm, tk=tk,
                    vmem_limit_bytes=vmem_limit_bytes)
    logp = sage_layer(a_p, h2, w3l_p, w3r_p, bb3, m3,
                      out_dim_pad=out_p, out_valid=out_dim, final=True,
                      out_dtype=jnp.float32, tm=tm, tk=tk,
                      vmem_limit_bytes=vmem_limit_bytes)
    return logp[:n, :out_dim]


def build_normalized_adjacency(edge_index, num_nodes):
    """A_norm[i, j] = 1/deg(i) if edge j -> i exists (PyG source_to_target flow)."""
    # TODO(synk): for large sparse graphs, replace this dense N x N matmul path
    # with a CSR neighbor-list + scalar-prefetch gather kernel.
    src, dst = edge_index
    a = jnp.zeros((num_nodes, num_nodes), jnp.float32).at[dst, src].add(1.0)
    deg = jnp.sum(a, axis=1, keepdims=True)
    return a / jnp.maximum(deg, 1.0)


if __name__ == "__main__":
    key = jax.random.PRNGKey(0)

    # Small synthetic graph "data" consistent with the module's __init__:
    num_nodes = 8
    in_dim = 4        # data.num_features
    hidden_dim = 16
    out_dim = 3       # data.num_classes
    num_edges = 24
    dropout_p = 0.2

    keys = jax.random.split(key, 12)
    x = jax.random.normal(keys[0], (num_nodes, in_dim), jnp.float32)
    edge_index = jax.random.randint(keys[1], (2, num_edges), 0, num_nodes)
    a_norm = build_normalized_adjacency(edge_index, num_nodes)

    # Deterministic parameter init (lin_l has bias, lin_r has none, per PyG SAGEConv).
    def glorot(k, shape):
        fan_in, fan_out = shape
        lim = jnp.sqrt(6.0 / (fan_in + fan_out))
        return jax.random.uniform(k, shape, jnp.float32, -lim, lim)

    w1l = glorot(keys[2], (in_dim, hidden_dim))
    w1r = glorot(keys[3], (in_dim, hidden_dim))
    b1 = jnp.zeros((hidden_dim,), jnp.float32)
    w2l = glorot(keys[4], (hidden_dim, hidden_dim))
    w2r = glorot(keys[5], (hidden_dim, hidden_dim))
    b2 = jnp.zeros((hidden_dim,), jnp.float32)
    w3l = glorot(keys[6], (hidden_dim, out_dim))
    w3r = glorot(keys[7], (hidden_dim, out_dim))
    b3 = jnp.zeros((out_dim,), jnp.float32)
    params = (w1l, w1r, b1, w2l, w2r, b2, w3l, w3r, b3)

    out = graphsage_forward(a_norm, x, params, dropout_p=dropout_p,
                            rng_key=keys[8], tm=256, tk=512)
    out = jax.block_until_ready(out)

    assert out.shape == (num_nodes, out_dim), out.shape
    assert bool(jnp.all(jnp.isfinite(out)))
    print("KERNEL_OK")
</pallas_src>

<mosaic_0001>
module attributes {stable_mosaic.version = 11 : i64} {
  func.func @sage_layer_kernel(%arg0: i32, %arg1: i32, %arg2: memref<256x512xbf16, #tpu.memory_space<vmem>>, %arg3: memref<512x128xbf16, #tpu.memory_space<vmem>>, %arg4: memref<128x128xbf16, #tpu.memory_space<vmem>>, %arg5: memref<128x128xbf16, #tpu.memory_space<vmem>>, %arg6: memref<1x128xf32, #tpu.memory_space<vmem>>, %arg7: memref<256x128xf32, #tpu.memory_space<vmem>>, %arg8: memref<256x128xbf16, #tpu.memory_space<vmem>>, %arg9: memref<256x128xf32, #tpu.memory_space<vmem>>) attributes {dimension_semantics = [#tpu.dimension_semantics<parallel>, #tpu.dimension_semantics<arbitrary>], iteration_bounds = array<i64: 2, 1>, scalar_prefetch = 0 : i64, scratch_operands = 1 : i64, tpu.core_type = #tpu.core_type<tc>, window_params = [{transform_indices = @transform_0, window_bounds = array<i64: 256, 512>}, {pipeline_mode = #tpu.pipeline_mode<synchronous>, transform_indices = @transform_1, window_bounds = array<i64: 512, 128>}, {pipeline_mode = #tpu.pipeline_mode<synchronous>, transform_indices = @transform_2, window_bounds = array<i64: 128, 128>}, {pipeline_mode = #tpu.pipeline_mode<synchronous>, transform_indices = @transform_3, window_bounds = array<i64: 128, 128>}, {pipeline_mode = #tpu.pipeline_mode<synchronous>, transform_indices = @transform_4, window_bounds = array<i64: 1, 128>}, {transform_indices = @transform_5, window_bounds = array<i64: 256, 128>}, {transform_indices = @transform_6, window_bounds = array<i64: 256, 128>}]} {
    %c0_i32 = arith.constant 0 : i32
    %0 = arith.cmpi eq, %arg1, %c0_i32 : i32
    %1 = arith.extui %0 : i1 to i32
    %c0_i32_0 = arith.constant 0 : i32
    %2 = arith.cmpi ne, %1, %c0_i32_0 : i32
    scf.if %2 {
      %cst_9 = arith.constant 0.000000e+00 : f32
      %14 = vector.broadcast %cst_9 : f32 to vector<256x128xf32>
      %c0_10 = arith.constant 0 : index
      %c0_11 = arith.constant 0 : index
      %15 = vector.load %arg9[%c0_10, %c0_11] : memref<256x128xf32, #tpu.memory_space<vmem>>, vector<256x128xf32>
      tpu.vector_store %arg9[%c0_10, %c0_11], %14 {strides = array<i32>} : memref<256x128xf32, #tpu.memory_space<vmem>>, vector<256x128xf32>,
    } else {
    }
    %c512_i32 = arith.constant 512 : i32
    %3 = arith.muli %arg1, %c512_i32 : i32
    %4 = arith.index_cast %3 : i32 to index
    %c0 = arith.constant 0 : index
    %5 = vector.load %arg3[%4, %c0] : memref<512x128xbf16, #tpu.memory_space<vmem>>, vector<512x128xbf16>
    %c0_1 = arith.constant 0 : index
    %c0_2 = arith.constant 0 : index
    %6 = vector.load %arg9[%c0_1, %c0_2] : memref<256x128xf32, #tpu.memory_space<vmem>>, vector<256x128xf32>
    %c0_3 = arith.constant 0 : index
    %c0_4 = arith.constant 0 : index
    %7 = vector.load %arg2[%c0_3, %c0_4] : memref<256x512xbf16, #tpu.memory_space<vmem>>, vector<256x512xbf16>
    %cst = arith.constant dense<0.000000e+00> : vector<256x128xf32>
    %8 = tpu.matmul %7, %5, %cst {dimension_numbers = #tpu.dot_dimension_numbers<[1], [0], [0], [1], [0, 0, 1, 1], [], []>} : vector<256x512xbf16>, vector<512x128xbf16>, vector<256x128xf32> -> vector<256x128xf32>
    %9 = arith.addf %6, %8 : vector<256x128xf32>
    %c0_5 = arith.constant 0 : index
    %c0_6 = arith.constant 0 : index
    %10 = vector.load %arg9[%c0_5, %c0_6] : memref<256x128xf32, #tpu.memory_space<vmem>>, vector<256x128xf32>
    tpu.vector_store %arg9[%c0_5, %c0_6], %9 {strides = array<i32>} : memref<256x128xf32, #tpu.memory_space<vmem>>, vector<256x128xf32>,
    %c0_i32_7 = arith.constant 0 : i32
    %11 = arith.cmpi eq, %arg1, %c0_i32_7 : i32
    %12 = arith.extui %11 : i1 to i32
    %c0_i32_8 = arith.constant 0 : i32
    %13 = arith.cmpi ne, %12, %c0_i32_8 : i32
    scf.if %13 {
      %c256_i32 = arith.constant 256 : i32
      %14 = arith.muli %arg0, %c256_i32 : i32
      %15 = arith.index_cast %14 : i32 to index
      %c0_9 = arith.constant 0 : index
      %16 = vector.load %arg3[%15, %c0_9] : memref<512x128xbf16, #tpu.memory_space<vmem>>, vector<256x128xbf16>
      %c0_10 = arith.constant 0 : index
      %c0_11 = arith.constant 0 : index
      %17 = vector.load %arg9[%c0_10, %c0_11] : memref<256x128xf32, #tpu.memory_space<vmem>>, vector<256x128xf32>
      %18 = arith.truncf %17 : vector<256x128xf32> to vector<256x128xbf16>
      %c0_12 = arith.constant 0 : index
      %c0_13 = arith.constant 0 : index
      %19 = vector.load %arg4[%c0_12, %c0_13] : memref<128x128xbf16, #tpu.memory_space<vmem>>, vector<128x128xbf16>
      %cst_14 = arith.constant dense<0.000000e+00> : vector<256x128xf32>
      %20 = tpu.matmul %18, %19, %cst_14 {dimension_numbers = #tpu.dot_dimension_numbers<[1], [0], [0], [1], [0, 0, 1, 1], [], []>} : vector<256x128xbf16>, vector<128x128xbf16>, vector<256x128xf32> -> vector<256x128xf32>
      %c0_15 = arith.constant 0 : index
      %c0_16 = arith.constant 0 : index
      %21 = vector.load %arg5[%c0_15, %c0_16] : memref<128x128xbf16, #tpu.memory_space<vmem>>, vector<128x128xbf16>
      %cst_17 = arith.constant dense<0.000000e+00> : vector<256x128xf32>
      %22 = tpu.matmul %16, %21, %cst_17 {dimension_numbers = #tpu.dot_dimension_numbers<[1], [0], [0], [1], [0, 0, 1, 1], [], []>} : vector<256x128xbf16>, vector<128x128xbf16>, vector<256x128xf32> -> vector<256x128xf32>
      %23 = arith.addf %20, %22 : vector<256x128xf32>
      %c0_18 = arith.constant 0 : index
      %c0_19 = arith.constant 0 : index
      %24 = vector.load %arg6[%c0_18, %c0_19] : memref<1x128xf32, #tpu.memory_space<vmem>>, vector<1x128xf32>
      %25 = vector.broadcast %24 : vector<1x128xf32> to vector<256x128xf32>
      %26 = arith.addf %23, %25 : vector<256x128xf32>
      %cst_20 = arith.constant 0.000000e+00 : f32
      %27 = vector.broadcast %cst_20 : f32 to vector<256x128xf32>
      %28 = arith.cmpf ogt, %26, %27 : vector<256x128xf32>
      %cst_21 = arith.constant 0.000000e+00 : f32
      %29 = vector.broadcast %cst_21 : f32 to vector<256x128xf32>
      %30 = arith.minimumf %26, %29 : vector<256x128xf32>
      %31 = math.exp %30 : vector<256x128xf32>
      %cst_22 = arith.constant 1.000000e+00 : f32
      %32 = vector.broadcast %cst_22 : f32 to vector<256x128xf32>
      %33 = arith.subf %31, %32 : vector<256x128xf32>
      %34 = arith.select %28, %26, %33 : vector<256x128xi1>, vector<256x128xf32>
      %c0_23 = arith.constant 0 : index
      %c0_24 = arith.constant 0 : index
      %35 = vector.load %arg7[%c0_23, %c0_24] : memref<256x128xf32, #tpu.memory_space<vmem>>, vector<256x128xf32>
      %36 = arith.mulf %34, %35 : vector<256x128xf32>
      %37 = arith.truncf %36 : vector<256x128xf32> to vector<256x128xbf16>
      %c0_25 = arith.constant 0 : index
      %c0_26 = arith.constant 0 : index
      %38 = vector.load %arg8[%c0_25, %c0_26] : memref<256x128xbf16, #tpu.memory_space<vmem>>, vector<256x128xbf16>
      tpu.vector_store %arg8[%c0_25, %c0_26], %37 {strides = array<i32>} : memref<256x128xbf16, #tpu.memory_space<vmem>>, vector<256x128xbf16>,
    } else {
    }
    return
  }
  func.func @transform_0(%arg0: i32, %arg1: i32) -> (i32, i32) {
    %c0_i32 = arith.constant 0 : i32
    return %arg0, %arg1 : i32, i32
  }
  func.func @transform_1(%arg0: i32, %arg1: i32) -> (i32, i32) {
    %c0_i32 = arith.constant 0 : i32
    %c0_i32_0 = arith.constant 0 : i32
    %c0_i32_1 = arith.constant 0 : i32
    return %c0_i32, %c0_i32_0 : i32, i32
  }
  func.func @transform_2(%arg0: i32, %arg1: i32) -> (i32, i32) {
    %c0_i32 = arith.constant 0 : i32
    %c0_i32_0 = arith.constant 0 : i32
    %c0_i32_1 = arith.constant 0 : i32
    return %c0_i32, %c0_i32_0 : i32, i32
  }
  func.func @transform_3(%arg0: i32, %arg1: i32) -> (i32, i32) {
    %c0_i32 = arith.constant 0 : i32
    %c0_i32_0 = arith.constant 0 : i32
    %c0_i32_1 = arith.constant 0 : i32
    return %c0_i32, %c0_i32_0 : i32, i32
  }
  func.func @transform_4(%arg0: i32, %arg1: i32) -> (i32, i32) {
    %c0_i32 = arith.constant 0 : i32
    %c0_i32_0 = arith.constant 0 : i32
    %c0_i32_1 = arith.constant 0 : i32
    return %c0_i32, %c0_i32_0 : i32, i32
  }
  func.func @transform_5(%arg0: i32, %arg1: i32) -> (i32, i32) {
    %c0_i32 = arith.constant 0 : i32
    %c0_i32_0 = arith.constant 0 : i32
    return %arg0, %c0_i32 : i32, i32
  }
  func.func @transform_6(%arg0: i32, %arg1: i32) -> (i32, i32) {
    %c0_i32 = arith.constant 0 : i32
    %c0_i32_0 = arith.constant 0 : i32
    return %arg0, %c0_i32 : i32, i32
  }
}

</mosaic_0001>

<bundles_post_ra>
// kernel: tpu_custom_call.1
= control target key start
LH: loop header
LB: loop body
LE: loop exit
PB: predicated region body
PF: predicated region fallthrough
CT: control target
= control target key end

     0   :  { %s4584_s0 = inlined_call_operand.hbm [shape: bf16[512,512], index: 0, kind: input, shape index: {}]   ;;  %s4585_s1 = inlined_call_operand.hbm [shape: bf16[512,128], index: 1, kind: input, shape index: {}]   ;;  %s4586_s2 = inlined_call_operand.hbm [shape: bf16[128,128], index: 2, kind: input, shape index: {}]   ;;  %s4587_s3 = inlined_call_operand.hbm [shape: bf16[128,128], index: 3, kind: input, shape index: {}]   ;;  %s4588_s4 = inlined_call_operand.vmem [shape: f32[1,128], index: 4, kind: input, shape index: {}]   ;;  %s4589_s5 = inlined_call_operand.hbm [shape: f32[512,128], index: 5, kind: input, shape index: {}]   ;;  %s4590_s6 = inlined_call_operand.hbm [shape: bf16[512,128], index: 6, kind: output, shape index: {}]  }
   0x1   :  { %4601 = sst [smem:[#allocation21_spill]] %s4584_s0 }
   0x2   :  { %4602 = sst [smem:[#allocation22_spill]] %s4585_s1 }
   0x3   :  { %11 = vsyncpa [#allocation4], 0 }
   0x4   :  { %13 = vsyncpa [#allocation4 + $0x1], 0 }
   0x5   :  { %14 = vsyncpa [#allocation7], 0 }
   0x6   :  { %15 = vsyncpa [#allocation10], 0 }
   0x7   :  { %16 = vsyncpa [#allocation5], 0 }
   0x8   :  { %18 = vsyncpa [#allocation5 + $0x1], 0  ;;  %s4039_s21 = smov 0   ;;  %s4041_s22 = smov 0  }
   0x9   :  { %s4043_s23 = smov 0   ;;  %s4045_s24 = smov 0  }
   0xa   :  { %s4047_s25 = smov 0   ;;  %s4049_s26 = smov 0  }
   0xb LB: > { %4603 = sst [smem:[#allocation18_spill]] %s3968_s21  ;;  %s4070_s27 = sadd.s32 4294967295, %s3988_s26   ;;  %s3988_s26 = sphi %s4049_s26, %s24_s26   ;;  %s3984_s25 = sphi %s4047_s25, %s4633_s25   ;;  %s3980_s24 = sphi %s4045_s24, %s4632_s24   ;;  %s3976_s23 = sphi %s4043_s23, %s4631_s23   ;;  %s3972_s22 = sphi %s4041_s22, %s4630_s22   ;;  %s3968_s21 = sphi %s4039_s21, %s4629_s21  }
   0xc   : > { %s2713_s28 = sadd.s32 4294967294, %s3988_s26   ;;  %p58_p0 = scmp.ne.s32.totalorder %s3972_s22, %s3968_s21 }
   0xd   : > { %p4597_p1 = scmp.eq.s32.totalorder %s4070_s27, 0  ;;  %p198_p3 = scmp.eq.s32.totalorder %s2713_s28, 1 }
   0xe   : > { %p2714_p5 = scmp.ge.s32.totalorder %s3988_s26, 1  ;;  %p205_p7 = scmp.lt.s32.totalorder %s3988_s26, 3 }
   0xf   : > { %p4079_p4 = por %p4597_p1, %p58_p0  ;;  %p4084_p6 = por %p198_p3, %p58_p0 }
  0x10   : > { %p4089_p8 = pnand %p2714_p5, %p205_p7  ;;  %s3990_s8 = smov [#allocation6]  }
  0x11   : > { %s4605_s30 = scalar_select %p4084_p6, 1, 0 }
  0x12   : > { %s217_s9 = sshll.u32 %s3990_s8, 4  ;;  %p3450_p9 = pneg %p4089_p8  ;;  %s218_s9 = int_to_ptr.vmem [resolvable:$true] %s217_s9 }
  0x13   : > { %4606 = sst [smem:[#allocation19_spill]] %s4605_s30  ;;  %s36_s11 = sadd.s32 1, %s3984_s25 }
  0x14   : > { %p4098_p11 = pnand %p3450_p9, %p4597_p1  ;;  %s3773_s12 = scalar_lea.vmem %s218_s9, 4096 }
  0x15   : > { %p3774_p13 = scmp.ne.s32.totalorder %s218_s9, %s3773_s12  ;;  %p3781_p5 = scmp.lt.s32.totalorder %s218_s9, %s218_s9 }
  0x16   : > { %p4598_p12 = pneg %p4098_p11  ;;  %p3782_p7 = scmp.lt.s32.totalorder %s3773_s12, %s3773_s12 }
  0x18   : > { %p3776_p0 = pnand %p3774_p13, %p4598_p12  ;;  %p3783_p2 = por %p3782_p7, %p3781_p5 }
  0x1a   : > { %p3777_p3 = pneg %p3776_p0 }
  0x1c   : > { %p3784_p10 = pnand %p3783_p2, %p3777_p3 }
  0x1e   : > { %3787 = shalt.err (!%p3784_p10)
}
  0x1f   : > { %s4591_s13 = smov 64   ;;  %s4593_s14 = smov 4  }
  0x20   : > { %s4609_s1 = sld [smem:[#allocation22_spill]]  ;;  %p38_p2 = scmp.ge.s32.totalorder %s36_s11, 2 }
  0x21   : > { %s45_s17 = sadd.s32 1, %s3976_s23  ;;  %p52_p9 = scmp.ne.s32.totalorder %s3976_s23, %s3972_s22 }
  0x22   : > { %p53_p10 = scmp.eq.s32.totalorder %s3988_s26, 0  ;;  %s4635_s11 = smov (%p38_p2, %s36_s11), 0 }
  0x23   : > { %4610 = sst [smem:[#allocation20_spill]] %s4635_s11  ;;  %p4612_p0 = scmp.eq.s32.totalorder %s4070_s27, 1 }
  0x24   : > { %p4122_p13 = por %p53_p10, %p52_p9  ;;  %s40_s20 = ssub.s32 %s3984_s25, %s4635_s11 }
  0x25   : > { %p4128_p3 = por %p4612_p0, %p52_p9  ;;  %p3474_p5 = scmp.lt.s32.totalorder %s3988_s26, 2 }
  0x26   : > { %3453 = dma.hbm_to_vmem [thread:$0]  (!%p4098_p11), %s4609_s1, 4096, %s218_s9, [#allocation7], %s4591_s13, %s4591_s13, %s4593_s14  }
  0x27   : > { %p43_p7 = scmp.eq.s32.totalorder %s40_s20, 0  ;;  %s260_s28 = sand.u32 1, %s3988_s26  }
  0x28   : > { %s262_s8 = sand.u32 1, %s3976_s23   ;;  %s2934_s15 = sshll.u32 %s3984_s25, 13 }
  0x29   : > { %s4138_s9 = scalar_select %p43_p7, %s3976_s23, %s45_s17  }
  0x2a   : > { %s2719_s12 = sshll.u32 %s262_s8, 9  ;;  %s4614_s0 = sld [smem:[#allocation21_spill]] }
  0x2b   : > { %s264_s1 = scalar_lea.vmem [#allocation3], %s2719_s12  ;;  %p4148_p2 = pnand %p3474_p5, %p4122_p13 }
  0x2c   : > { %s274_s30 = sshll.u32 %s264_s1, 4  ;;  %s4152_s20 = scalar_lea.sflag [#allocation4], %s260_s28  ;;  %s275_s30 = int_to_ptr.vmem [resolvable:$true] %s274_s30 }
  0x2d   : > { %p4600_p9 = pneg %p4148_p2  ;;  %s3801_s17 = scalar_lea.vmem %s275_s30, 8192 }
  0x2e   : > { %p3802_p10 = scmp.ne.s32.totalorder %s275_s30, %s3801_s17  ;;  %s3993_s13 = smov [#allocation3]  }
  0x2f   : > { %s3806_s1 = sshll.u32 %s3993_s13, 4  ;;  %s3807_s1 = int_to_ptr.vmem [resolvable:$false] %s3806_s1 }
  0x30   : > { %s273_s14 = scalar_lea.hbm %s4614_s0, %s2934_s15  ;;  %p3804_p0 = pnand %p3802_p10, %p4600_p9 }
  0x31   : > { %s3808_s18 = scalar_lea.vmem %s3807_s1, 16384  ;;  %p3809_p13 = scmp.lt.s32.totalorder %s275_s30, %s3807_s1 }
  0x32   : > { %p3805_p7 = pneg %p3804_p0  ;;  %p3810_p5 = scmp.lt.s32.totalorder %s3808_s18, %s3801_s17 }
  0x34   : > { %p3811_p1 = por %p3810_p5, %p3809_p13 }
  0x36   : > { %p3812_p12 = pnand %p3811_p1, %p3805_p7 }
  0x38   : > { %3815 = shalt.err (!%p3812_p12)
}
  0x39   : > { %s3994_s12 = smov 256   ;;  %s3995_s28 = smov 16  }
  0x3a   : > { %3463 = dma.hbm_to_vmem [thread:$0]  (!%p4148_p2), %s273_s14, 8192, %s275_s30, %s4152_s20, %s3994_s12, %s3994_s12, %s3995_s28  }
  0x3b   : > { %s2723_s15 = sshll.u32 %s262_s8, 8  ;;  %s3996_s16 = smov [#allocation8]  }
  0x3c   : > { %s230_s0 = sshll.u32 %s3996_s16, 4  ;;  %s288_s13 = scalar_lea.vmem [#allocation11], %s2723_s15  ;;  %s231_s0 = int_to_ptr.vmem [resolvable:$true] %s230_s0 }
  0x3d   : > { %s295_s11 = sshll.u32 %s288_s13, 4  ;;  %s3827_s1 = scalar_lea.vmem %s231_s0, 1024  ;;  %s4181_s11 = int_to_ptr.vmem [resolvable:$true] %s295_s11 }
  0x3e   : > { %p3828_p10 = scmp.ne.s32.totalorder %s231_s0, %s3827_s1  ;;  %p4616_p1 = pneg %p4098_p11 }
  0x3f   : > { %p3835_p7 = scmp.lt.s32.totalorder %s231_s0, %s231_s0  ;;  %p3836_p13 = scmp.lt.s32.totalorder %s3827_s1, %s3827_s1 }
  0x40   : > { %p3830_p12 = pnand %p3828_p10, %p4616_p1 }
  0x41   : > { %p3837_p5 = por %p3836_p13, %p3835_p7 }
  0x42   : > { %p3831_p0 = pneg %p3830_p12 }
  0x44   : > { %p3838_p9 = pnand %p3837_p5, %p3831_p0 }
  0x46   : > { %3841 = shalt.err (!%p3838_p9)
}
  0x47   : > { %s4617_s30 = smov 4   ;;  %s4618_s14 = smov 64  }
  0x48   : > { %3456 = dma.hbm_to_vmem [thread:$0]  (!%p4098_p11), %s4586_s2, 1024, %s231_s0, [#allocation7], %s4618_s14, %s4618_s14, %s4617_s30  }
  0x49   : > { %s2935_s18 = sshll.u32 %s3984_s25, 12  ;;  %s3997_s12 = smov [#allocation9]  }
  0x4a   : > { %s243_s28 = sshll.u32 %s3997_s12, 4  ;;  %s4179_s13 = scalar_lea.hbm %s4589_s5, %s2935_s18  ;;  %s244_s28 = int_to_ptr.vmem [resolvable:$true] %s243_s28 }
  0x4b   : > { %s3853_s1 = scalar_lea.vmem %s244_s28, 1024  ;;  %p4619_p10 = pmov %p4616_p1 }
  0x4c   : > { %p3854_p9 = scmp.ne.s32.totalorder %s244_s28, %s3853_s1  ;;  %p3861_p0 = scmp.lt.s32.totalorder %s244_s28, %s244_s28 }
  0x4d   : > { %p3862_p7 = scmp.lt.s32.totalorder %s3853_s1, %s3853_s1 }
  0x4e   : > { %p3856_p1 = pnand %p3854_p9, %p4619_p10 }
  0x4f   : > { %p3863_p13 = por %p3862_p7, %p3861_p0 }
  0x50   : > { %p3857_p12 = pneg %p3856_p1 }
  0x52   : > { %p3864_p5 = pnand %p3863_p13, %p3857_p12 }
  0x54   : > { %3867 = shalt.err (!%p3864_p5)
}
  0x55   : > { %3459 = dma.hbm_to_vmem [thread:$0]  (!%p4098_p11), %s4587_s3, 1024, %s244_s28, [#allocation10], %s4618_s14, %s4618_s14, %s4617_s30  }
  0x56   : > { %s3881_s17 = scalar_lea.vmem %s4181_s11, 4096  ;;  %p4620_p10 = pneg %p4148_p2 }
  0x57   : > { %p3882_p9 = scmp.ne.s32.totalorder %s4181_s11, %s3881_s17  ;;  %s3998_s18 = smov [#allocation11]  }
  0x58   : > { %s3886_s12 = sshll.u32 %s3998_s18, 4  ;;  %s3887_s12 = int_to_ptr.vmem [resolvable:$false] %s3886_s12 }
  0x59   : > { %p3884_p1 = pnand %p3882_p9, %p4620_p10  ;;  %s3888_s10 = scalar_lea.vmem %s3887_s12, 8192 }
  0x5a   : > { %p3889_p0 = scmp.lt.s32.totalorder %s4181_s11, %s3887_s12  ;;  %p3890_p7 = scmp.lt.s32.totalorder %s3888_s10, %s3881_s17 }
  0x5b   : > { %p3885_p12 = pneg %p3884_p1 }
  0x5c   : > { %p3891_p13 = por %p3890_p7, %p3889_p0 }
  0x5e   : > { %p3892_p5 = pnand %p3891_p13, %p3885_p12 }
  0x60   : > { %3895 = shalt.err (!%p3892_p5)
}
  0x61   : > { %s3999_s15 = smov 128   ;;  %s4000_s30 = smov 8  }
  0x62   : > { %3466 = dma.hbm_to_vmem [thread:$0]  (!%p4148_p2), %s4179_s13, 4096, %s4181_s11, %s4152_s20, %s3999_s15, %s3999_s15, %s4000_s30  }
  0x63   : > { %307 = sbr.rel (%p4089_p8) target bundleno = 718 (0x2ce), region = 44  ;;  %s309_s14 = sand.u32 (!%p4089_p8), 1, %s4070_s27  }
  0x64   : > { %s4209_s28 = sand.u32 (!%p4089_p8), 1, %s3972_s22   ;;  %s310_s1 = scalar_lea.sflag (!%p4089_p8), [#allocation4], %s309_s14 }
  0x65   : > { %s2727_s16 = sshll.u32 (!%p4089_p8), %s4209_s28, 9 }
  0x66   : > { %s4212_s0 = scalar_lea.vmem (!%p4089_p8), [#allocation3], %s2727_s16 }
  0x68   : > { %3947 = dma.done.wait (%p4079_p4), %s310_s1, 8192  }
  0x69   : > { %3949 = vsyncadd (%p4079_p4), %s310_s1, 4294959104  ;;  %p4621_p11 = scmp.eq.s32.totalorder %s4070_s27, 0 }
  0x6b   : > { %3951 = dma.done.wait (%p4621_p11), [#allocation7], 5120   ;;  %p4622_p8 = pmov %p4621_p11 }
  0x6d   : > { %3953 = vsyncadd (%p4622_p8), [#allocation7], 4294962176  ;;  %p4623_p2 = pmov %p4622_p8 }
  0x6f   : > { %3955 = dma.done.wait (%p4623_p2), [#allocation10], 1024   ;;  %p4624_p9 = pmov %p4623_p2 }
  0x70   : > { %s2731_s21 = sshll.u32 %s4209_s28, 8 }
  0x71   : > { %3957 = vsyncadd (%p4624_p9), [#allocation10], 4294966272  ;;  %s4227_s7 = scalar_lea.vmem [#allocation11], %s2731_s21 }
  0x72   : > { %3959 = dma.done.wait (%p4079_p4), %s310_s1, 4096  }
  0x73   : > { %3961 = vsyncadd (%p4079_p4), %s310_s1, 4294963200  ;;  %v3538_v0 = vld [vmem:[#allocation6 + $0x78] sm:$0xff]   ;;  %v3542_v4 = vld [vmem:[#allocation6 + $0x70] sm:$0xff]   ;;  %s2829_s27 = sshll.u32 %s3980_s24, 8  ;;  %s2732_s17 = sshll.u32 %s4209_s28, 7 }
  0x74   : > { %v3539_v1 = vld [vmem:[#allocation6 + $0xf8] sm:$0xff]   ;;  %3064 = vmatprep.subr.bf16.mxu0 %v3538_v0  ;;  %v3543_v5 = vld [vmem:[#allocation6 + $0xf0] sm:$0xff]   ;;  %v3546_v8 = vld [vmem:[#allocation6 + $0x68] sm:$0xff]   ;;  %s1476_s29 = sshra.s32 %s2829_s27, 3  ;;  %s4346_s18 = scalar_lea.vmem [#allocation12], %s2732_s17 }
  0x75   : > { %v3540_v2 = vld [vmem:[#allocation6 + $0x38] sm:$0xff]   ;;  %3176 = vmatprep.subr.bf16.mxu1 %v3539_v1  ;;  %v3544_v6 = vld [vmem:[#allocation6 + $0x30] sm:$0xff]   ;;  %v3547_v9 = vld [vmem:[#allocation6 + $0xe8] sm:$0xff]   ;;  %s2830_s11 = sshll.u32 %s1476_s29, 2  ;;  %s2968_s12 = sshll.u32 %s3980_s24, 11 }
  0x76   : > { %v3541_v3 = vld [vmem:[#allocation6 + $0xb8] sm:$0xff]   ;;  %3065 = vmatpush3.bf16.msra.mxu0 %v3540_v2  ;;  %v3545_v7 = vld [vmem:[#allocation6 + $0xb0] sm:$0xff]   ;;  %v3548_v10 = vld [vmem:[#allocation6 + $0x28] sm:$0xff]   ;;  %s4283_s20 = scalar_lea.vmem [#allocation6], %s2830_s11  ;;  %s2575_s10 = sshll.u32 %s4346_s18, 4  ;;  %s4535_s10 = int_to_ptr.vmem [resolvable:$true] %s2575_s10 }
  0x77   : > { %3177 = vmatpush3.bf16.msra.mxu1 %v3541_v3  ;;  %3066 = vmatprep.subr.bf16.mxu0 %v3542_v4  ;;  %v3549_v11 = vld [vmem:[#allocation6 + $0xa8] sm:$0xff]   ;;  %v3550_v12 = vld [vmem:[#allocation6 + $0x60] sm:$0xff]   ;;  %v3554_v16 = vld [vmem:[#allocation6 + $0x58] sm:$0xff]   ;;  %s4533_s14 = scalar_lea.hbm %s4590_s6, %s2968_s12  ;;  %s2562_s16 = scalar_lea.sflag [#allocation5], %s4209_s28 }
  0x78   : > { %3178 = vmatprep.subr.bf16.mxu1 %v3543_v5  ;;  %v3551_v13 = vld [vmem:[#allocation6 + $0xe0] sm:$0xff]   ;;  %v3555_v17 = vld [vmem:[#allocation6 + $0xd8] sm:$0xff]   ;;  %v3558_v20 = vld [vmem:[#allocation6 + $0x50] sm:$0xff]   ;;  %s3896_s24 = scalar_lea.vmem %s4535_s10, 2048  ;;  %s4001_s1 = smov [#allocation12]  }
  0x79   : > { %v3552_v14 = vld [vmem:[#allocation6 + $0x20] sm:$0xff]   ;;  %v3556_v18 = vld [vmem:[#allocation6 + $0x18] sm:$0xff]   ;;  %v3559_v21 = vld [vmem:[#allocation6 + $0xd0] sm:$0xff]   ;;  %p3897_p4 = scmp.ne.s32.totalorder %s4535_s10, %s3896_s24 }
  0x7a   : > { %3067 = vmatpush3.bf16.msra.mxu0 %v3544_v6  ;;  %v3553_v15 = vld [vmem:[#allocation6 + $0xa0] sm:$0xff]   ;;  %v3557_v19 = vld [vmem:[#allocation6 + $0x98] sm:$0xff]   ;;  %v3560_v22 = vld [vmem:[#allocation6 + $0x10] sm:$0xff]  }
  0x7b   : > { %3179 = vmatpush3.bf16.msra.mxu1 %v3545_v7  ;;  %3068 = vmatprep.subr.bf16.mxu0 %v3546_v8  ;;  %v3561_v23 = vld [vmem:[#allocation6 + $0x90] sm:$0xff]   ;;  %v3562_v24 = vld [vmem:[#allocation6 + $0x48] sm:$0xff]   ;;  %v3566_v28 = vld [vmem:[#allocation6 + $0x40] sm:$0xff]   ;;  %p3898_p10 = pnand %p3897_p4, %p4128_p3 }
  0x7c   : > { %3180 = vmatprep.subr.bf16.mxu1 %v3547_v9  ;;  %v3563_v25 = vld [vmem:[#allocation6 + $0xc8] sm:$0xff]   ;;  %v3567_v29 = vld [vmem:[#allocation6 + $0xc0] sm:$0xff]   ;;  %v3666_v58 = vld [vmem:[#allocation9 + $0x38] sm:$0xff]  }
  0x7d   : > { %v3564_v26 = vld [vmem:[#allocation6 + $0x8] sm:$0xff]   ;;  %v3568_v30 = vld [vmem:[#allocation6] sm:$0xff]   ;;  %v3667_v59 = vld [vmem:[#allocation8 + $0x38] sm:$0xff]   ;;  %p3899_p1 = pneg %p3898_p10 }
  0x7e   : > { %3069 = vmatpush3.bf16.msra.mxu0 %v3548_v10  ;;  %v3565_v27 = vld [vmem:[#allocation6 + $0x88] sm:$0xff]   ;;  %v3569_v31 = vld [vmem:[#allocation6 + $0x80] sm:$0xff]   ;;  %v3668_v60 = vld [vmem:[#allocation9 + $0x30] sm:$0xff]  }
  0x7f   : > { %3181 = vmatpush3.bf16.msra.mxu1 %v3549_v11  ;;  %3070 = vmatprep.subr.bf16.mxu0 %v3550_v12  ;;  %v3570_v32 = vld [vmem:[%s4212_s0] ss:$16 sps:$4 sm:$0xff]   ;;  %v3572_v33 = vld [vmem:[%s4212_s0 + $0x4] ss:$16 sps:$4 sm:$0xff]   ;;  %v3573_v34 = vld [vmem:[%s4212_s0 + $0x8] ss:$16 sps:$4 sm:$0xff]  }
  0x80   : > { %3182 = vmatprep.subr.bf16.mxu1 %v3551_v13  ;;  %v3575_v35 = vld [vmem:[%s4212_s0 + $0xc] ss:$16 sps:$4 sm:$0xff]   ;;  %1118 = vmatprep.mubr.bf16.mxu0 %v3572_v33  ;;  %v3576_v36 = vld [vmem:[%s4212_s0 + $0x24] ss:$16 sps:$4 sm:$0xff]   ;;  %v3580_v38 = vld [vmem:[%s4212_s0 + $0x20] ss:$16 sps:$4 sm:$0xff]  }
  0x81   : > { %1279 = vmatprep.mubr.bf16.mxu1 %v3575_v35  ;;  %v3578_v37 = vld [vmem:[%s4212_s0 + $0x2c] ss:$16 sps:$4 sm:$0xff]   ;;  %v3581_v39 = vld [vmem:[%s4212_s0 + $0x28] ss:$16 sps:$4 sm:$0xff]   ;;  %v3582_v40 = vld [vmem:[%s4212_s0 + $0x44] ss:$16 sps:$4 sm:$0xff]  }
  0x82   : > { %3071 = vmatpush3.bf16.msra.mxu0 %v3552_v14  ;;  %v3584_v41 = vld [vmem:[%s4212_s0 + $0x4c] ss:$16 sps:$4 sm:$0xff]   ;;  %v3586_v42 = vld [vmem:[%s4212_s0 + $0x40] ss:$16 sps:$4 sm:$0xff]   ;;  %v3587_v43 = vld [vmem:[%s4212_s0 + $0x48] ss:$16 sps:$4 sm:$0xff]  }
  0x83   : > { %3183 = vmatpush3.bf16.msra.mxu1 %v3553_v15  ;;  %3072 = vmatprep.subr.bf16.mxu0 %v3554_v16  ;;  %v3588_v44 = vld [vmem:[%s4212_s0 + $0x64] ss:$16 sps:$4 sm:$0xff]   ;;  %v3590_v45 = vld [vmem:[%s4212_s0 + $0x6c] ss:$16 sps:$4 sm:$0xff]   ;;  %v3592_v46 = vld [vmem:[%s4212_s0 + $0x60] ss:$16 sps:$4 sm:$0xff]  }
  0x84   : > { %3184 = vmatprep.subr.bf16.mxu1 %v3555_v17  ;;  %v3593_v47 = vld [vmem:[%s4212_s0 + $0x68] ss:$16 sps:$4 sm:$0xff]   ;;  %v3594_v48 = vld [vmem:[%s4212_s0 + $0x84] ss:$16 sps:$4 sm:$0xff]   ;;  %v3596_v49 = vld [vmem:[%s4212_s0 + $0x8c] ss:$16 sps:$4 sm:$0xff]  }
  0x85   : > { %v3598_v50 = vld [vmem:[%s4212_s0 + $0x80] ss:$16 sps:$4 sm:$0xff]   ;;  %v3599_v51 = vld [vmem:[%s4212_s0 + $0x88] ss:$16 sps:$4 sm:$0xff]   ;;  %v3600_v52 = vld [vmem:[%s4212_s0 + $0xa4] ss:$16 sps:$4 sm:$0xff]  }
  0x86   : > { %3073 = vmatpush3.bf16.msra.mxu0 %v3556_v18  ;;  %v3602_v53 = vld [vmem:[%s4212_s0 + $0xac] ss:$16 sps:$4 sm:$0xff]   ;;  %v3604_v54 = vld [vmem:[%s4212_s0 + $0xa0] ss:$16 sps:$4 sm:$0xff]   ;;  %v3605_v55 = vld [vmem:[%s4212_s0 + $0xa8] ss:$16 sps:$4 sm:$0xff]  }
  0x87   : > { %3185 = vmatpush3.bf16.msra.mxu1 %v3557_v19  ;;  %3074 = vmatprep.subr.bf16.mxu0 %v3558_v20  ;;  %v3606_v56 = vld [vmem:[%s4212_s0 + $0xc4] ss:$16 sps:$4 sm:$0xff]   ;;  %v3608_v57 = vld [vmem:[%s4212_s0 + $0xcc] ss:$16 sps:$4 sm:$0xff]   ;;  %v3610_v61 = vld [vmem:[%s4212_s0 + $0xc0] ss:$16 sps:$4 sm:$0xff]  }
  0x88   : > { %3186 = vmatprep.subr.bf16.mxu1 %v3559_v21  ;;  %v3669_v62 = vld [vmem:[#allocation8 + $0x30] sm:$0xff]   ;;  %v3611_v63 = vld [vmem:[%s4212_s0 + $0xc8] ss:$16 sps:$4 sm:$0xff]   ;;  %v3614_v1 = vld [vmem:[%s4212_s0 + $0xec] ss:$16 sps:$4 sm:$0xff]  }
  0x89   : > { %v3612_v0 = vld [vmem:[%s4212_s0 + $0xe4] ss:$16 sps:$4 sm:$0xff]   ;;  %v3670_v2 = vld [vmem:[#allocation9 + $0x28] sm:$0xff]   ;;  %v3616_v6 = vld [vmem:[%s4212_s0 + $0xe0] ss:$16 sps:$4 sm:$0xff]  }
  0x8a   : > { %3075 = vmatpush3.bf16.msra.mxu0 %v3560_v22  ;;  %v3671_v3 = vld [vmem:[#allocation8 + $0x28] sm:$0xff]   ;;  %v3672_v4 = vld [vmem:[#allocation9 + $0x20] sm:$0xff]   ;;  %v3674_v15 = vld [vmem:[#allocation9 + $0x18] sm:$0xff]  }
  0x8b   : > { %3187 = vmatpush3.bf16.msra.mxu1 %v3561_v23  ;;  %3076 = vmatprep.subr.bf16.mxu0 %v3562_v24  ;;  %v3673_v5 = vld [vmem:[#allocation8 + $0x20] sm:$0xff]   ;;  %v3617_v7 = vld [vmem:[%s4212_s0 + $0xe8] ss:$16 sps:$4 sm:$0xff]   ;;  %v3620_v9 = vld [vmem:[%s4212_s0 + $0x10c] ss:$16 sps:$4 sm:$0xff]  }
  0x8c   : > { %3188 = vmatprep.subr.bf16.mxu1 %v3563_v25  ;;  %v3618_v8 = vld [vmem:[%s4212_s0 + $0x104] ss:$16 sps:$4 sm:$0xff]   ;;  %v3622_v10 = vld [vmem:[%s4212_s0 + $0x100] ss:$16 sps:$4 sm:$0xff]   ;;  %v3623_v11 = vld [vmem:[%s4212_s0 + $0x108] ss:$16 sps:$4 sm:$0xff]  }
  0x8d   : > { %v3624_v12 = vld [vmem:[%s4212_s0 + $0x124] ss:$16 sps:$4 sm:$0xff]   ;;  %v3626_v13 = vld [vmem:[%s4212_s0 + $0x12c] ss:$16 sps:$4 sm:$0xff]   ;;  %v3628_v14 = vld [vmem:[%s4212_s0 + $0x120] ss:$16 sps:$4 sm:$0xff]  }
  0x8e   : > { %3077 = vmatpush3.bf16.msra.mxu0 %v3564_v26  ;;  %v3675_v16 = vld [vmem:[#allocation8 + $0x18] sm:$0xff]   ;;  %v3630_v18 = vld [vmem:[%s4212_s0 + $0x144] ss:$16 sps:$4 sm:$0xff]   ;;  %v3634_v22 = vld [vmem:[%s4212_s0 + $0x140] ss:$16 sps:$4 sm:$0xff]  }
  0x8f   : > { %3189 = vmatpush3.bf16.msra.mxu1 %v3565_v27  ;;  %3078 = vmatprep.subr.bf16.mxu0 %v3566_v28  ;;  %v3629_v17 = vld [vmem:[%s4212_s0 + $0x128] ss:$16 sps:$4 sm:$0xff]   ;;  %v3632_v19 = vld [vmem:[%s4212_s0 + $0x14c] ss:$16 sps:$4 sm:$0xff]   ;;  %v3676_v20 = vld [vmem:[#allocation9 + $0x10] sm:$0xff]  }
  0x90   : > { %3190 = vmatprep.subr.bf16.mxu1 %v3567_v29  ;;  %v3677_v21 = vld [vmem:[#allocation8 + $0x10] sm:$0xff]   ;;  %v3678_v23 = vld [vmem:[#allocation9 + $0x8] sm:$0xff]   ;;  %v3680_v28 = vld [vmem:[#allocation9] sm:$0xff]  }
  0x91   : > { %v3679_v24 = vld [vmem:[#allocation8 + $0x8] sm:$0xff]   ;;  %v3636_v26 = vld [vmem:[%s4212_s0 + $0x164] ss:$16 sps:$4 sm:$0xff]  }
  0x92   : > { %3079 = vmatpush3.bf16.msra.mxu0 %v3568_v30  ;;  %v3635_v25 = vld [vmem:[%s4212_s0 + $0x148] ss:$16 sps:$4 sm:$0xff]   ;;  %v3638_v27 = vld [vmem:[%s4212_s0 + $0x16c] ss:$16 sps:$4 sm:$0xff]   ;;  %v3681_v29 = vld [vmem:[#allocation8] sm:$0xff]  }
  0x93   : > { %3191 = vmatpush3.bf16.msra.mxu1 %v3569_v31  ;;  %3336 = vmatprep.subr.bf16.mxu0 %v3666_v58  ;;  %v3640_v30 = vld [vmem:[%s4212_s0 + $0x160] ss:$16 sps:$4 sm:$0xff]   ;;  %v3641_v31 = vld [vmem:[%s4212_s0 + $0x168] ss:$16 sps:$4 sm:$0xff]   ;;  %v3644_v33 = vld [vmem:[%s4212_s0 + $0x18c] ss:$16 sps:$4 sm:$0xff]  }
  0x94   : > { %3384 = vmatprep.subr.bf16.mxu1 %v3667_v59  ;;  %v3647_v35 = vld [vmem:[%s4212_s0 + $0x188] ss:$16 sps:$4 sm:$0xff]  }
  0x95   : > { %1119 = vmatmul.mubr.bf16.vlgmr.msra.gmra.mxu0 %v3570_v32  ;;  %v3642_v32 = vld [vmem:[%s4212_s0 + $0x184] ss:$16 sps:$4 sm:$0xff]  }
  0x96   : > { %1280 = vmatmul.mubr.bf16.vlgmr.msra.gmra.mxu1 %v3573_v34  ;;  %1126 = vmatprep.mubr.bf16.mxu0 %v3576_v36  ;;  %v3646_v34 = vld [vmem:[%s4212_s0 + $0x180] ss:$16 sps:$4 sm:$0xff]   ;;  %v3648_v36 = vld [vmem:[%s4212_s0 + $0x1a4] ss:$16 sps:$4 sm:$0xff]  }
  0x97   : > { %1287 = vmatprep.mubr.bf16.mxu1 %v3578_v37  ;;  %3337 = vmatpush3.bf16.msra.mxu0 %v3666_v58  ;;  %v3650_v37 = vld [vmem:[%s4212_s0 + $0x1ac] ss:$16 sps:$4 sm:$0xff]   ;;  %v3692_v58 = vld [vmem:[%s4283_s20 + $0x50] sm:$0xff]  }
  0x98   : > { %3385 = vmatpush3.bf16.msra.mxu1 %v3667_v59  ;;  %3338 = vmatprep.subr.bf16.mxu0 %v3668_v60  ;;  %v3693_v59 = vld [vmem:[%s4283_s20 + $0x58] sm:$0xff]  }
  0x99   : > { %3386 = vmatprep.subr.bf16.mxu1 %v3669_v62 }
  0x9b   : > { %3339 = vmatpush3.bf16.msra.mxu0 %v3668_v60  ;;  %v3694_v60 = vld [vmem:[%s4283_s20 + $0x60] sm:$0xff]  }
  0x9c   : > { %3387 = vmatpush3.bf16.msra.mxu1 %v3669_v62  ;;  %3340 = vmatprep.subr.bf16.mxu0 %v3670_v2  ;;  %v3696_v62 = vld [vmem:[%s4283_s20 + $0x70] sm:$0xff]  }
  0x9d   : > { %1127 = vmatmul.mubr.bf16.gmra.mxu0 %v3580_v38  ;;  %3388 = vmatprep.subr.bf16.mxu1 %v3671_v3  ;;  %v3652_v38 = vld [vmem:[%s4212_s0 + $0x1a0] ss:$16 sps:$4 sm:$0xff]  }
  0x9e   : > { %1288 = vmatmul.mubr.bf16.gmra.mxu1 %v3581_v39  ;;  %1134 = vmatprep.mubr.bf16.mxu0 %v3582_v40  ;;  %v3653_v39 = vld [vmem:[%s4212_s0 + $0x1a8] ss:$16 sps:$4 sm:$0xff]   ;;  %v3654_v40 = vld [vmem:[%s4212_s0 + $0x1c4] ss:$16 sps:$4 sm:$0xff]  }
  0x9f   : > { %1295 = vmatprep.mubr.bf16.mxu1 %v3584_v41  ;;  %3341 = vmatpush3.bf16.msra.mxu0 %v3670_v2  ;;  %v3656_v41 = vld [vmem:[%s4212_s0 + $0x1cc] ss:$16 sps:$4 sm:$0xff]  }
  0xa0   : > { %3389 = vmatpush3.bf16.msra.mxu1 %v3671_v3  ;;  %3342 = vmatprep.subr.bf16.mxu0 %v3672_v4 }
  0xa1   : > { %3390 = vmatprep.subr.bf16.mxu1 %v3673_v5 }
  0xa3   : > { %3343 = vmatpush3.bf16.msra.mxu0 %v3672_v4 }
  0xa4   : > { %3391 = vmatpush3.bf16.msra.mxu1 %v3673_v5  ;;  %3344 = vmatprep.subr.bf16.mxu0 %v3674_v15 }
  0xa5   : > { %1135 = vmatmul.mubr.bf16.gmra.mxu0 %v3586_v42  ;;  %3392 = vmatprep.subr.bf16.mxu1 %v3675_v16  ;;  %v3658_v42 = vld [vmem:[%s4212_s0 + $0x1c0] ss:$16 sps:$4 sm:$0xff]  }
  0xa6   : > { %1296 = vmatmul.mubr.bf16.gmra.mxu1 %v3587_v43  ;;  %1142 = vmatprep.mubr.bf16.mxu0 %v3588_v44  ;;  %v3659_v43 = vld [vmem:[%s4212_s0 + $0x1c8] ss:$16 sps:$4 sm:$0xff]   ;;  %v3660_v44 = vld [vmem:[%s4212_s0 + $0x1e4] ss:$16 sps:$4 sm:$0xff]  }
  0xa7   : > { %1303 = vmatprep.mubr.bf16.mxu1 %v3590_v45  ;;  %3345 = vmatpush3.bf16.msra.mxu0 %v3674_v15  ;;  %v3662_v45 = vld [vmem:[%s4212_s0 + $0x1ec] ss:$16 sps:$4 sm:$0xff]  }
  0xa8   : > { %3393 = vmatpush3.bf16.msra.mxu1 %v3675_v16  ;;  %3346 = vmatprep.subr.bf16.mxu0 %v3676_v20 }
  0xa9   : > { %3394 = vmatprep.subr.bf16.mxu1 %v3677_v21 }
  0xab   : > { %3347 = vmatpush3.bf16.msra.mxu0 %v3676_v20 }
  0xac   : > { %3395 = vmatpush3.bf16.msra.mxu1 %v3677_v21  ;;  %3348 = vmatprep.subr.bf16.mxu0 %v3678_v23 }
  0xad   : > { %1143 = vmatmul.mubr.bf16.gmra.mxu0 %v3592_v46  ;;  %3396 = vmatprep.subr.bf16.mxu1 %v3679_v24  ;;  %v3664_v46 = vld [vmem:[%s4212_s0 + $0x1e0] ss:$16 sps:$4 sm:$0xff]  }
  0xae   : > { %1304 = vmatmul.mubr.bf16.gmra.mxu1 %v3593_v47  ;;  %1150 = vmatprep.mubr.bf16.mxu0 %v3594_v48  ;;  %v3665_v47 = vld [vmem:[%s4212_s0 + $0x1e8] ss:$16 sps:$4 sm:$0xff]   ;;  %v3682_v48 = vld [vmem:[%s4283_s20] sm:$0xff]   ;;  %s3900_s0 = sshll.u32 %s4001_s1, 4  ;;  %s3901_s0 = int_to_ptr.vmem [resolvable:$false] %s3900_s0 }
  0xaf   : > { %1311 = vmatprep.mubr.bf16.mxu1 %v3596_v49  ;;  %3349 = vmatpush3.bf16.msra.mxu0 %v3678_v23  ;;  %v3683_v49 = vld [vmem:[%s4283_s20 + $0x8] sm:$0xff]   ;;  %s3902_s21 = scalar_lea.vmem %s3901_s0, 4096  ;;  %p3903_p12 = scmp.lt.s32.totalorder %s4535_s10, %s3901_s0 }
  0xb0   : > { %3397 = vmatpush3.bf16.msra.mxu1 %v3679_v24  ;;  %3350 = vmatprep.subr.bf16.mxu0 %v3680_v28  ;;  %p3904_p0 = scmp.lt.s32.totalorder %s3902_s21, %s3896_s24 }
  0xb1   : > { %3398 = vmatprep.subr.bf16.mxu1 %v3681_v29 }
  0xb2   : > { %p3905_p7 = por %p3904_p0, %p3903_p12 }
  0xb3   : > { %3351 = vmatpush3.bf16.msra.mxu0 %v3680_v28 }
  0xb4   : > { %3399 = vmatpush3.bf16.msra.mxu1 %v3681_v29  ;;  %p3906_p13 = pnand %p3905_p7, %p3899_p1 }
  0xb5   : > { %1151 = vmatmul.mubr.bf16.gmra.mxu0 %v3598_v50  ;;  %v3684_v50 = vld [vmem:[%s4283_s20 + $0x10] sm:$0xff]  }
  0xb6   : > { %1312 = vmatmul.mubr.bf16.gmra.mxu1 %v3599_v51  ;;  %1158 = vmatprep.mubr.bf16.mxu0 %v3600_v52  ;;  %v3685_v51 = vld [vmem:[%s4283_s20 + $0x18] sm:$0xff]   ;;  %v3686_v52 = vld [vmem:[%s4283_s20 + $0x20] sm:$0xff]  }
  0xb7   : > { %1319 = vmatprep.mubr.bf16.mxu1 %v3602_v53  ;;  %v3687_v53 = vld [vmem:[%s4283_s20 + $0x28] sm:$0xff]  }
  0xbd   : > { %1159 = vmatmul.mubr.bf16.gmra.mxu0 %v3604_v54  ;;  %v3688_v54 = vld [vmem:[%s4283_s20 + $0x30] sm:$0xff]  }
  0xbe   : > { %1320 = vmatmul.mubr.bf16.gmra.mxu1 %v3605_v55  ;;  %1166 = vmatprep.mubr.bf16.mxu0 %v3606_v56  ;;  %v3689_v55 = vld [vmem:[%s4283_s20 + $0x38] sm:$0xff]   ;;  %v3690_v56 = vld [vmem:[%s4283_s20 + $0x40] sm:$0xff]  }
  0xbf   : > { %1327 = vmatprep.mubr.bf16.mxu1 %v3608_v57  ;;  %v3691_v57 = vld [vmem:[%s4283_s20 + $0x48] sm:$0xff]  }
  0xc5   : > { %1167 = vmatmul.mubr.bf16.gmra.mxu0 %v3610_v61  ;;  %v3695_v61 = vld [vmem:[%s4283_s20 + $0x68] sm:$0xff]  }
  0xc6   : > { %1328 = vmatmul.mubr.bf16.gmra.mxu1 %v3611_v63  ;;  %1174 = vmatprep.mubr.bf16.mxu0 %v3612_v0  ;;  %v3697_v63 = vld [vmem:[%s4283_s20 + $0x78] sm:$0xff]  }
  0xc7   : > { %1335 = vmatprep.mubr.bf16.mxu1 %v3614_v1 }
  0xcd   : > { %1175 = vmatmul.mubr.bf16.gmra.mxu0 %v3616_v6 }
  0xce   : > { %1336 = vmatmul.mubr.bf16.gmra.mxu1 %v3617_v7  ;;  %1182 = vmatprep.mubr.bf16.mxu0 %v3618_v8 }
  0xcf   : > { %1343 = vmatprep.mubr.bf16.mxu1 %v3620_v9 }
  0xd5   : > { %1183 = vmatmul.mubr.bf16.gmra.mxu0 %v3622_v10 }
  0xd6   : > { %1344 = vmatmul.mubr.bf16.gmra.mxu1 %v3623_v11  ;;  %1190 = vmatprep.mubr.bf16.mxu0 %v3624_v12 }
  0xd7   : > { %1351 = vmatprep.mubr.bf16.mxu1 %v3626_v13 }
  0xdd   : > { %1191 = vmatmul.mubr.bf16.gmra.mxu0 %v3628_v14 }
  0xde   : > { %1352 = vmatmul.mubr.bf16.gmra.mxu1 %v3629_v17  ;;  %1198 = vmatprep.mubr.bf16.mxu0 %v3630_v18 }
  0xdf   : > { %1359 = vmatprep.mubr.bf16.mxu1 %v3632_v19 }
  0xe5   : > { %1199 = vmatmul.mubr.bf16.gmra.mxu0 %v3634_v22 }
  0xe6   : > { %1360 = vmatmul.mubr.bf16.gmra.mxu1 %v3635_v25  ;;  %1206 = vmatprep.mubr.bf16.mxu0 %v3636_v26 }
  0xe7   : > { %1367 = vmatprep.mubr.bf16.mxu1 %v3638_v27 }
  0xed   : > { %1207 = vmatmul.mubr.bf16.gmra.mxu0 %v3640_v30 }
  0xee   : > { %1368 = vmatmul.mubr.bf16.gmra.mxu1 %v3641_v31  ;;  %1214 = vmatprep.mubr.bf16.mxu0 %v3642_v32 }
  0xef   : > { %1375 = vmatprep.mubr.bf16.mxu1 %v3644_v33 }
  0xf5   : > { %1215 = vmatmul.mubr.bf16.gmra.mxu0 %v3646_v34 }
  0xf6   : > { %1376 = vmatmul.mubr.bf16.gmra.mxu1 %v3647_v35  ;;  %1222 = vmatprep.mubr.bf16.mxu0 %v3648_v36 }
  0xf7   : > { %1383 = vmatprep.mubr.bf16.mxu1 %v3650_v37 }
  0xfd   : > { %1223 = vmatmul.mubr.bf16.gmra.mxu0 %v3652_v38 }
  0xfe   : > { %1384 = vmatmul.mubr.bf16.gmra.mxu1 %v3653_v39  ;;  %1230 = vmatprep.mubr.bf16.mxu0 %v3654_v40 }
  0xff   : > { %1391 = vmatprep.mubr.bf16.mxu1 %v3656_v41 }
 0x105   : > { %1231 = vmatmul.mubr.bf16.gmra.mxu0 %v3658_v42 }
 0x106   : > { %1392 = vmatmul.mubr.bf16.gmra.mxu1 %v3659_v43  ;;  %1238 = vmatprep.mubr.bf16.mxu0 %v3660_v44 }
 0x107   : > { %1399 = vmatprep.mubr.bf16.mxu1 %v3662_v45 }
 0x10d   : > { %1239 = vmatmul.mubr.bf16.gmra.mxu0 %v3664_v46 }
 0x10e   : > { %1400 = vmatmul.mubr.bf16.gmra.mxu1 %v3665_v47  ;;  %3352 = vmatprep.mubr.bf16.mxu0 %v3682_v48 }
 0x115   : > { %3353 = vmatmul.mubr.bf16.vlgmr.msra.gmra.mxu0 %v3683_v49 }
 0x116   : > { %3356 = vmatprep.mubr.bf16.mxu0 %v3684_v50 }
 0x11d   : > { %3357 = vmatmul.mubr.bf16.gmra.mxu0 %v3685_v51 }
 0x11e   : > { %3360 = vmatprep.mubr.bf16.mxu0 %v3686_v52 }
 0x125   : > { %3361 = vmatmul.mubr.bf16.gmra.mxu0 %v3687_v53 }
 0x126   : > { %3364 = vmatprep.mubr.bf16.mxu0 %v3688_v54 }
 0x12d   : > { %3365 = vmatmul.mubr.bf16.gmra.mxu0 %v3689_v55 }
 0x12e   : > { %3368 = vmatprep.mubr.bf16.mxu0 %v3690_v56 }
 0x135   : > { %3369 = vmatmul.mubr.bf16.gmra.mxu0 %v3691_v57 }
 0x136   : > { %3372 = vmatprep.mubr.bf16.mxu0 %v3692_v58 }
 0x13d   : > { %3373 = vmatmul.mubr.bf16.gmra.mxu0 %v3693_v59 }
 0x13e   : > { %3376 = vmatprep.mubr.bf16.mxu0 %v3694_v60 }
 0x145   : > { %3377 = vmatmul.mubr.bf16.gmra.mxu0 %v3695_v61 }
 0x146   : > { %3380 = vmatprep.mubr.bf16.mxu0 %v3696_v62 }
 0x14d   : > { %3381 = vmatmul.mubr.bf16.gmra.mxu0 %v3697_v63 }
 0x155   : > { %v3080_v0 = vpop.f32.mrf.mxu0 }
 0x156   : > { %v3192_v1 = vpop.f32.mrf.mxu1 }
 0x157   : > { %v3081_v2 = vpop.f32.mrf.mxu0 }
 0x158   : > { %v3193_v3 = vpop.f32.mrf.mxu1  ;;  %v3082_v6 = vadd.f32 %v3081_v2, %v3080_v0 }
 0x159   : > { %v3083_v4 = vpop.f32.mrf.mxu0  ;;  %v3194_v7 = vadd.f32 %v3193_v3, %v3192_v1 }
 0x15a   : > { %v3195_v5 = vpop.f32.mrf.mxu1 }
 0x15b   : > { %v3084_v8 = vpop.f32.mrf.mxu0  ;;  %v1282_v14 = vadd.f32 %v3194_v7, %v3082_v6 }
 0x15c   : > { %v3085_v9 = vadd.f32 %v3084_v8, %v3083_v4  ;;  %v3196_v10 = vpop.f32.mrf.mxu1 }
 0x15d   : > { %v3197_v11 = vadd.f32 %v3196_v10, %v3195_v5  ;;  %v3086_v12 = vpop.f32.mrf.mxu0 }
 0x15e   : > { %v3198_v13 = vpop.f32.mrf.mxu1 }
 0x15f   : > { %v1285_v15 = vadd.f32 %v3197_v11, %v3085_v9  ;;  %v3087_v16 = vpop.f32.mrf.mxu0 }
 0x160   : > { %v3199_v17 = vpop.f32.mrf.mxu1  ;;  %v3088_v21 = vadd.f32 %v3087_v16, %v3086_v12 }
 0x161   : > { %v3089_v18 = vpop.f32.mrf.mxu0  ;;  %v1544_v19 = vpack.c.bf16 %v1285_v15, %v1282_v14  ;;  %v3200_v22 = vadd.f32 %v3199_v17, %v3198_v13 }
 0x162   : > { %v3201_v20 = vpop.f32.mrf.mxu1 }
 0x163   : > { %3400 = vmatprep.mubr.bf16.mxu1 %v1544_v19  ;;  %v3090_v23 = vpop.f32.mrf.mxu0  ;;  %v1290_v29 = vadd.f32 %v3200_v22, %v3088_v21 }
 0x164   : > { %v3091_v24 = vadd.f32 %v3090_v23, %v3089_v18  ;;  %v3202_v25 = vpop.f32.mrf.mxu1 }
 0x165   : > { %v3203_v26 = vadd.f32 %v3202_v25, %v3201_v20  ;;  %v3092_v27 = vpop.f32.mrf.mxu0 }
 0x166   : > { %v3204_v28 = vpop.f32.mrf.mxu1 }
 0x167   : > { %v1293_v30 = vadd.f32 %v3203_v26, %v3091_v24  ;;  %v3093_v31 = vpop.f32.mrf.mxu0 }
 0x168   : > { %v3205_v32 = vpop.f32.mrf.mxu1  ;;  %v3094_v36 = vadd.f32 %v3093_v31, %v3092_v27 }
 0x169   : > { %v1545_v33 = vpack.c.bf16 %v1293_v30, %v1290_v29  ;;  %v3095_v34 = vpop.f32.mrf.mxu0  ;;  %v3206_v37 = vadd.f32 %v3205_v32, %v3204_v28 }
 0x16a   : > { %v3207_v35 = vpop.f32.mrf.mxu1 }
 0x16b   : > { %3401 = vmatmul.mubr.bf16.vlgmr.msra.gmra.mxu1 %v1545_v33  ;;  %v3096_v38 = vpop.f32.mrf.mxu0  ;;  %v1298_v44 = vadd.f32 %v3206_v37, %v3094_v36 }
 0x16c   : > { %v3097_v39 = vadd.f32 %v3096_v38, %v3095_v34  ;;  %v3208_v40 = vpop.f32.mrf.mxu1 }
 0x16d   : > { %v3209_v41 = vadd.f32 %v3208_v40, %v3207_v35  ;;  %v3098_v42 = vpop.f32.mrf.mxu0 }
 0x16e   : > { %v3210_v43 = vpop.f32.mrf.mxu1 }
 0x16f   : > { %v1301_v45 = vadd.f32 %v3209_v41, %v3097_v39  ;;  %v3099_v46 = vpop.f32.mrf.mxu0 }
 0x170   : > { %v3211_v47 = vpop.f32.mrf.mxu1  ;;  %v3100_v51 = vadd.f32 %v3099_v46, %v3098_v42 }
 0x171   : > { %v3101_v48 = vpop.f32.mrf.mxu0  ;;  %v1546_v49 = vpack.c.bf16 %v1301_v45, %v1298_v44  ;;  %v3212_v52 = vadd.f32 %v3211_v47, %v3210_v43 }
 0x172   : > { %v3213_v50 = vpop.f32.mrf.mxu1 }
 0x173   : > { %3404 = vmatprep.mubr.bf16.mxu1 %v1546_v49  ;;  %v3102_v53 = vpop.f32.mrf.mxu0  ;;  %v1306_v59 = vadd.f32 %v3212_v52, %v3100_v51 }
 0x174   : > { %v3103_v54 = vadd.f32 %v3102_v53, %v3101_v48  ;;  %v3214_v55 = vpop.f32.mrf.mxu1 }
 0x175   : > { %v3215_v56 = vadd.f32 %v3214_v55, %v3213_v50  ;;  %v3104_v57 = vpop.f32.mrf.mxu0 }
 0x176   : > { %v3216_v58 = vpop.f32.mrf.mxu1 }
 0x177   : > { %v1309_v60 = vadd.f32 %v3215_v56, %v3103_v54  ;;  %v3105_v61 = vpop.f32.mrf.mxu0 }
 0x178   : > { %v3217_v62 = vpop.f32.mrf.mxu1  ;;  %v3106_v2 = vadd.f32 %v3105_v61, %v3104_v57 }
 0x179   : > { %v3107_v63 = vpop.f32.mrf.mxu0  ;;  %v1547_v0 = vpack.c.bf16 %v1309_v60, %v1306_v59  ;;  %v3218_v3 = vadd.f32 %v3217_v62, %v3216_v58 }
 0x17a   : > { %v3219_v1 = vpop.f32.mrf.mxu1 }
 0x17b   : > { %3405 = vmatmul.mubr.bf16.gmra.mxu1 %v1547_v0  ;;  %v3108_v4 = vpop.f32.mrf.mxu0  ;;  %v1314_v10 = vadd.f32 %v3218_v3, %v3106_v2 }
 0x17c   : > { %v3109_v5 = vadd.f32 %v3108_v4, %v3107_v63  ;;  %v3220_v6 = vpop.f32.mrf.mxu1 }
 0x17d   : > { %v3221_v7 = vadd.f32 %v3220_v6, %v3219_v1  ;;  %v3110_v8 = vpop.f32.mrf.mxu0 }
 0x17e   : > { %v3222_v9 = vpop.f32.mrf.mxu1 }
 0x17f   : > { %v1317_v11 = vadd.f32 %v3221_v7, %v3109_v5  ;;  %v3111_v12 = vpop.f32.mrf.mxu0 }
 0x180   : > { %v3223_v13 = vpop.f32.mrf.mxu1  ;;  %v3112_v17 = vadd.f32 %v3111_v12, %v3110_v8 }
 0x181   : > { %v3113_v14 = vpop.f32.mrf.mxu0  ;;  %v1548_v15 = vpack.c.bf16 %v1317_v11, %v1314_v10  ;;  %v3224_v18 = vadd.f32 %v3223_v13, %v3222_v9 }
 0x182   : > { %v3225_v16 = vpop.f32.mrf.mxu1 }
 0x183   : > { %3408 = vmatprep.mubr.bf16.mxu1 %v1548_v15  ;;  %v3114_v19 = vpop.f32.mrf.mxu0  ;;  %v1322_v25 = vadd.f32 %v3224_v18, %v3112_v17 }
 0x184   : > { %v3115_v20 = vadd.f32 %v3114_v19, %v3113_v14  ;;  %v3226_v21 = vpop.f32.mrf.mxu1 }
 0x185   : > { %v3227_v22 = vadd.f32 %v3226_v21, %v3225_v16  ;;  %v3116_v23 = vpop.f32.mrf.mxu0 }
 0x186   : > { %v3228_v24 = vpop.f32.mrf.mxu1 }
 0x187   : > { %v1325_v26 = vadd.f32 %v3227_v22, %v3115_v20  ;;  %v3117_v27 = vpop.f32.mrf.mxu0 }
 0x188   : > { %v3229_v28 = vpop.f32.mrf.mxu1  ;;  %v3118_v32 = vadd.f32 %v3117_v27, %v3116_v23 }
 0x189   : > { %v3119_v29 = vpop.f32.mrf.mxu0  ;;  %v1549_v30 = vpack.c.bf16 %v1325_v26, %v1322_v25  ;;  %v3230_v33 = vadd.f32 %v3229_v28, %v3228_v24 }
 0x18a   : > { %v3231_v31 = vpop.f32.mrf.mxu1 }
 0x18b   : > { %3409 = vmatmul.mubr.bf16.gmra.mxu1 %v1549_v30  ;;  %v3120_v34 = vpop.f32.mrf.mxu0  ;;  %v1330_v40 = vadd.f32 %v3230_v33, %v3118_v32 }
 0x18c   : > { %v3121_v35 = vadd.f32 %v3120_v34, %v3119_v29  ;;  %v3232_v36 = vpop.f32.mrf.mxu1 }
 0x18d   : > { %v3233_v37 = vadd.f32 %v3232_v36, %v3231_v31  ;;  %v3122_v38 = vpop.f32.mrf.mxu0 }
 0x18e   : > { %v3234_v39 = vpop.f32.mrf.mxu1 }
 0x18f   : > { %v1333_v41 = vadd.f32 %v3233_v37, %v3121_v35  ;;  %v3123_v42 = vpop.f32.mrf.mxu0 }
 0x190   : > { %v3235_v43 = vpop.f32.mrf.mxu1  ;;  %v3124_v47 = vadd.f32 %v3123_v42, %v3122_v38 }
 0x191   : > { %v3125_v44 = vpop.f32.mrf.mxu0  ;;  %v1550_v45 = vpack.c.bf16 %v1333_v41, %v1330_v40  ;;  %v3236_v48 = vadd.f32 %v3235_v43, %v3234_v39 }
 0x192   : > { %v3237_v46 = vpop.f32.mrf.mxu1 }
 0x193   : > { %3412 = vmatprep.mubr.bf16.mxu1 %v1550_v45  ;;  %v3126_v49 = vpop.f32.mrf.mxu0  ;;  %v1338_v55 = vadd.f32 %v3236_v48, %v3124_v47 }
 0x194   : > { %v3127_v50 = vadd.f32 %v3126_v49, %v3125_v44  ;;  %v3238_v51 = vpop.f32.mrf.mxu1 }
 0x195   : > { %v3239_v52 = vadd.f32 %v3238_v51, %v3237_v46  ;;  %v3128_v53 = vpop.f32.mrf.mxu0 }
 0x196   : > { %v3240_v54 = vpop.f32.mrf.mxu1 }
 0x197   : > { %v1341_v56 = vadd.f32 %v3239_v52, %v3127_v50  ;;  %v3129_v57 = vpop.f32.mrf.mxu0 }
 0x198   : > { %v3241_v58 = vpop.f32.mrf.mxu1  ;;  %v3130_v62 = vadd.f32 %v3129_v57, %v3128_v53 }
 0x199   : > { %v3131_v59 = vpop.f32.mrf.mxu0  ;;  %v1551_v60 = vpack.c.bf16 %v1341_v56, %v1338_v55  ;;  %v3242_v63 = vadd.f32 %v3241_v58, %v3240_v54 }
 0x19a   : > { %v3243_v61 = vpop.f32.mrf.mxu1 }
 0x19b   : > { %3413 = vmatmul.mubr.bf16.gmra.mxu1 %v1551_v60  ;;  %v3132_v0 = vpop.f32.mrf.mxu0  ;;  %v1346_v6 = vadd.f32 %v3242_v63, %v3130_v62 }
 0x19c   : > { %v3133_v1 = vadd.f32 %v3132_v0, %v3131_v59  ;;  %v3244_v2 = vpop.f32.mrf.mxu1 }
 0x19d   : > { %v3245_v3 = vadd.f32 %v3244_v2, %v3243_v61  ;;  %v3134_v4 = vpop.f32.mrf.mxu0 }
 0x19e   : > { %v3246_v5 = vpop.f32.mrf.mxu1 }
 0x19f   : > { %v1349_v7 = vadd.f32 %v3245_v3, %v3133_v1  ;;  %v3135_v8 = vpop.f32.mrf.mxu0 }
 0x1a0   : > { %v3247_v9 = vpop.f32.mrf.mxu1  ;;  %v3136_v13 = vadd.f32 %v3135_v8, %v3134_v4 }
 0x1a1   : > { %v3137_v10 = vpop.f32.mrf.mxu0  ;;  %v1552_v11 = vpack.c.bf16 %v1349_v7, %v1346_v6  ;;  %v3248_v14 = vadd.f32 %v3247_v9, %v3246_v5 }
 0x1a2   : > { %v3249_v12 = vpop.f32.mrf.mxu1 }
 0x1a3   : > { %3416 = vmatprep.mubr.bf16.mxu1 %v1552_v11  ;;  %v3138_v15 = vpop.f32.mrf.mxu0  ;;  %v1354_v21 = vadd.f32 %v3248_v14, %v3136_v13 }
 0x1a4   : > { %v3139_v16 = vadd.f32 %v3138_v15, %v3137_v10  ;;  %v3250_v17 = vpop.f32.mrf.mxu1 }
 0x1a5   : > { %v3251_v18 = vadd.f32 %v3250_v17, %v3249_v12  ;;  %v3140_v19 = vpop.f32.mrf.mxu0 }
 0x1a6   : > { %v3252_v20 = vpop.f32.mrf.mxu1 }
 0x1a7   : > { %v1357_v22 = vadd.f32 %v3251_v18, %v3139_v16  ;;  %v3141_v23 = vpop.f32.mrf.mxu0 }
 0x1a8   : > { %v3253_v24 = vpop.f32.mrf.mxu1  ;;  %v3142_v28 = vadd.f32 %v3141_v23, %v3140_v19 }
 0x1a9   : > { %v3143_v25 = vpop.f32.mrf.mxu0  ;;  %v1553_v26 = vpack.c.bf16 %v1357_v22, %v1354_v21  ;;  %v3254_v29 = vadd.f32 %v3253_v24, %v3252_v20 }
 0x1aa   : > { %v3255_v27 = vpop.f32.mrf.mxu1 }
 0x1ab   : > { %3417 = vmatmul.mubr.bf16.gmra.mxu1 %v1553_v26  ;;  %v3144_v30 = vpop.f32.mrf.mxu0  ;;  %v1362_v36 = vadd.f32 %v3254_v29, %v3142_v28 }
 0x1ac   : > { %v3145_v31 = vadd.f32 %v3144_v30, %v3143_v25  ;;  %v3256_v32 = vpop.f32.mrf.mxu1 }
 0x1ad   : > { %v3257_v33 = vadd.f32 %v3256_v32, %v3255_v27  ;;  %v3146_v34 = vpop.f32.mrf.mxu0 }
 0x1ae   : > { %v3258_v35 = vpop.f32.mrf.mxu1 }
 0x1af   : > { %v1365_v37 = vadd.f32 %v3257_v33, %v3145_v31  ;;  %v3147_v38 = vpop.f32.mrf.mxu0 }
 0x1b0   : > { %v3259_v39 = vpop.f32.mrf.mxu1  ;;  %v3148_v43 = vadd.f32 %v3147_v38, %v3146_v34 }
 0x1b1   : > { %v3149_v40 = vpop.f32.mrf.mxu0  ;;  %v1554_v41 = vpack.c.bf16 %v1365_v37, %v1362_v36  ;;  %v3260_v44 = vadd.f32 %v3259_v39, %v3258_v35 }
 0x1b2   : > { %v3261_v42 = vpop.f32.mrf.mxu1 }
 0x1b3   : > { %3420 = vmatprep.mubr.bf16.mxu1 %v1554_v41  ;;  %v3150_v45 = vpop.f32.mrf.mxu0  ;;  %v1370_v51 = vadd.f32 %v3260_v44, %v3148_v43 }
 0x1b4   : > { %v3151_v46 = vadd.f32 %v3150_v45, %v3149_v40  ;;  %v3262_v47 = vpop.f32.mrf.mxu1 }
 0x1b5   : > { %v3263_v48 = vadd.f32 %v3262_v47, %v3261_v42  ;;  %v3152_v49 = vpop.f32.mrf.mxu0 }
 0x1b6   : > { %v3264_v50 = vpop.f32.mrf.mxu1 }
 0x1b7   : > { %v1373_v52 = vadd.f32 %v3263_v48, %v3151_v46  ;;  %v3153_v53 = vpop.f32.mrf.mxu0 }
 0x1b8   : > { %v3265_v54 = vpop.f32.mrf.mxu1  ;;  %v3154_v58 = vadd.f32 %v3153_v53, %v3152_v49 }
 0x1b9   : > { %v3155_v55 = vpop.f32.mrf.mxu0  ;;  %v1555_v56 = vpack.c.bf16 %v1373_v52, %v1370_v51  ;;  %v3266_v59 = vadd.f32 %v3265_v54, %v3264_v50  ;;  %v4319_v51 = vld [vmem:[%s4588_s4] ss:$0 sm:$0xff] }
 0x1ba   : > { %v3267_v57 = vpop.f32.mrf.mxu1 }
 0x1bb   : > { %3421 = vmatmul.mubr.bf16.gmra.mxu1 %v1555_v56  ;;  %v3156_v60 = vpop.f32.mrf.mxu0  ;;  %v1378_v2 = vadd.f32 %v3266_v59, %v3154_v58 }
 0x1bc   : > { %v3157_v61 = vadd.f32 %v3156_v60, %v3155_v55  ;;  %v3268_v62 = vpop.f32.mrf.mxu1 }
 0x1bd   : > { %v3269_v63 = vadd.f32 %v3268_v62, %v3267_v57  ;;  %v3158_v0 = vpop.f32.mrf.mxu0 }
 0x1be   : > { %v3270_v1 = vpop.f32.mrf.mxu1 }
 0x1bf   : > { %v1381_v3 = vadd.f32 %v3269_v63, %v3157_v61  ;;  %v3159_v4 = vpop.f32.mrf.mxu0 }
 0x1c0   : > { %v3271_v5 = vpop.f32.mrf.mxu1  ;;  %v3160_v9 = vadd.f32 %v3159_v4, %v3158_v0 }
 0x1c1   : > { %v3161_v6 = vpop.f32.mrf.mxu0  ;;  %v1556_v7 = vpack.c.bf16 %v1381_v3, %v1378_v2  ;;  %v3272_v10 = vadd.f32 %v3271_v5, %v3270_v1 }
 0x1c2   : > { %v3273_v8 = vpop.f32.mrf.mxu1 }
 0x1c3   : > { %3424 = vmatprep.mubr.bf16.mxu1 %v1556_v7  ;;  %v3162_v11 = vpop.f32.mrf.mxu0  ;;  %v1386_v17 = vadd.f32 %v3272_v10, %v3160_v9 }
 0x1c4   : > { %v3163_v12 = vadd.f32 %v3162_v11, %v3161_v6  ;;  %v3274_v13 = vpop.f32.mrf.mxu1 }
 0x1c5   : > { %v3275_v14 = vadd.f32 %v3274_v13, %v3273_v8  ;;  %v3164_v15 = vpop.f32.mrf.mxu0 }
 0x1c6   : > { %v3276_v16 = vpop.f32.mrf.mxu1 }
 0x1c7   : > { %v1389_v18 = vadd.f32 %v3275_v14, %v3163_v12  ;;  %v3165_v19 = vpop.f32.mrf.mxu0 }
 0x1c8   : > { %v3277_v20 = vpop.f32.mrf.mxu1  ;;  %v3166_v24 = vadd.f32 %v3165_v19, %v3164_v15 }
 0x1c9   : > { %v3167_v21 = vpop.f32.mrf.mxu0  ;;  %v1557_v22 = vpack.c.bf16 %v1389_v18, %v1386_v17  ;;  %v3278_v25 = vadd.f32 %v3277_v20, %v3276_v16 }
 0x1ca   : > { %v3279_v23 = vpop.f32.mrf.mxu1 }
 0x1cb   : > { %3425 = vmatmul.mubr.bf16.gmra.mxu1 %v1557_v22  ;;  %v3168_v26 = vpop.f32.mrf.mxu0  ;;  %v1394_v32 = vadd.f32 %v3278_v25, %v3166_v24 }
 0x1cc   : > { %v3169_v27 = vadd.f32 %v3168_v26, %v3167_v21  ;;  %v3280_v28 = vpop.f32.mrf.mxu1 }
 0x1cd   : > { %v3281_v29 = vadd.f32 %v3280_v28, %v3279_v23  ;;  %v3170_v30 = vpop.f32.mrf.mxu0 }
 0x1ce   : > { %v3282_v31 = vpop.f32.mrf.mxu1 }
 0x1cf   : > { %v1397_v33 = vadd.f32 %v3281_v29, %v3169_v27  ;;  %v3171_v34 = vpop.f32.mrf.mxu0 }
 0x1d0   : > { %v3283_v35 = vpop.f32.mrf.mxu1  ;;  %v3172_v39 = vadd.f32 %v3171_v34, %v3170_v30 }
 0x1d1   : > { %v3173_v36 = vpop.f32.mrf.mxu0  ;;  %v1558_v37 = vpack.c.bf16 %v1397_v33, %v1394_v32  ;;  %v3284_v40 = vadd.f32 %v3283_v35, %v3282_v31  ;;  %v2339_v35 = vld [vmem:[%s4227_s7 + $0x10] sm:$0xff] }
 0x1d2   : > { %v3285_v38 = vpop.f32.mrf.mxu1 }
 0x1d3   : > { %3428 = vmatprep.mubr.bf16.mxu1 %v1558_v37  ;;  %v3174_v41 = vpop.f32.mrf.mxu0  ;;  %v1402_v45 = vadd.f32 %v3284_v40, %v3172_v39  ;;  %v2340_v39 = vld [vmem:[%s4227_s7 + $0x18] sm:$0xff] }
 0x1d4   : > { %v3175_v42 = vadd.f32 %v3174_v41, %v3173_v36  ;;  %v3286_v43 = vpop.f32.mrf.mxu1 }
 0x1d5   : > { %v3287_v44 = vadd.f32 %v3286_v43, %v3285_v38  ;;  %v3354_v48 = vpop.f32.mrf.mxu0 }
 0x1d7   : > { %v1405_v46 = vadd.f32 %v3287_v44, %v3175_v42  ;;  %v1770_v49 = vpop.f32.mrf.mxu0 }
 0x1d9   : > { %v1559_v47 = vpack.c.bf16 %v1405_v46, %v1402_v45  ;;  %v3355_v53 = vpop.f32.mrf.mxu0 }
 0x1db   : > { %3429 = vmatmul.mubr.bf16.gmra.mxu1 %v1559_v47  ;;  %v1773_v61 = vpop.f32.mrf.mxu0  ;;  %v2337_v47 = vld [vmem:[%s4227_s7] sm:$0xff] }
 0x1dd   : > { %v3358_v5 = vpop.f32.mrf.mxu0 }
 0x1df   : > { %v1786_v9 = vpop.f32.mrf.mxu0 }
 0x1e1   : > { %v3359_v13 = vpop.f32.mrf.mxu0 }
 0x1e3   : > { %v1789_v21 = vpop.f32.mrf.mxu0 }
 0x1e5   : > { %v3362_v32 = vpop.f32.mrf.mxu0 }
 0x1e7   : > { %v1802_v46 = vpop.f32.mrf.mxu0 }
 0x22b   : > { %v3402_v50 = vpop.f32.mrf.mxu1 }
 0x22c   : > { %v1988_v52 = vadd.f32 %v3402_v50, %v3354_v48  ;;  %v2338_v50 = vld [vmem:[%s4227_s7 + $0x8] sm:$0xff] }
 0x22d   : > { %v1979_v54 = vpop.f32.mrf.mxu1 }
 0x22e   : > { %v2115_v55 = vadd.f32 %v4319_v51, %v1988_v52  ;;  %v1980_v56 = vadd.f32 %v1979_v54, %v1770_v49 }
 0x22f   : > { %v3403_v57 = vpop.f32.mrf.mxu1 }
 0x230   : > { %v2179_v58 = vmin.f32 %v2115_v55, 0.0  ;;  %v2113_v59 = vadd.f32 %v4319_v51, %v1980_v56  ;;  %v1991_v60 = vadd.f32 %v3403_v57, %v3355_v53  ;;  %vm2147_vm0 = vcmp.gt.f32.partialorder %v2115_v55, 0.0 }
 0x231   : > { %v1982_v62 = vpop.f32.mrf.mxu1 }
 0x232   : > { %v2213_v63 = vmul.f32 1.442695, %v2179_v58  ;;  %v2177_v0 = vmin.f32 %v2113_v59, 0.0  ;;  %v2116_v1 = vadd.f32 %v4319_v51, %v1991_v60  ;;  %v1983_v2 = vadd.f32 %v1982_v62, %v1773_v61  ;;  %v3363_v60 = vpop.f32.mrf.mxu0 }
 0x233   : > { %vm2145_vm1 = vcmp.gt.f32.partialorder %v2113_v59, 0.0 }
 0x234   : > { %3698 = vpow2.f32 %v2213_v63  ;;  %v2209_v3 = vmul.f32 1.442695, %v2177_v0  ;;  %v2180_v4 = vmin.f32 %v2116_v1, 0.0  ;;  %v2114_v6 = vadd.f32 %v4319_v51, %v1983_v2 }
 0x235   : > { %vm2148_vm2 = vcmp.gt.f32.partialorder %v2116_v1, 0.0 }
 0x236   : > { %3700 = vpow2.f32 %v2209_v3  ;;  %v2215_v7 = vmul.f32 1.442695, %v2180_v4  ;;  %v2178_v8 = vmin.f32 %v2114_v6, 0.0  ;;  %vm2146_vm3 = vcmp.gt.f32.partialorder %v2114_v6, 0.0  ;;  %v1805_v4 = vpop.f32.mrf.mxu0 }
 0x238   : > { %3702 = vpow2.f32 %v2215_v7  ;;  %v2211_v10 = vmul.f32 1.442695, %v2178_v8 }
 0x23a   : > { %3704 = vpow2.f32 %v2211_v10 }
 0x23b   : > { %v3406_v11 = vpop.f32.mrf.mxu1 }
 0x23c   : > { %v2004_v12 = vadd.f32 %v3406_v11, %v3358_v5 }
 0x23d   : > { %v1995_v14 = vpop.f32.mrf.mxu1 }
 0x23e   : > { %v4326_v15 = vadd.f32 %v4319_v51, %v2004_v12  ;;  %v1996_v16 = vadd.f32 %v1995_v14, %v1786_v9 }
 0x23f   : > { %v3407_v17 = vpop.f32.mrf.mxu1 }
 0x240   : > { %v2183_v18 = vmin.f32 %v4326_v15, 0.0  ;;  %v4330_v19 = vadd.f32 %v4319_v51, %v1996_v16  ;;  %v2007_v20 = vadd.f32 %v3407_v17, %v3359_v13  ;;  %v3366_v16 = vpop.f32.mrf.mxu0  ;;  %vm2151_vm4 = vcmp.gt.f32.partialorder %v4326_v15, 0.0 }
 0x241   : > { %v3699_v22 = vpop.eup %3698  ;;  %v1998_v23 = vpop.f32.mrf.mxu1 }
 0x242   : > { %v2866_v24 = vadd.f32 -1.0, %v3699_v22  ;;  %v2221_v25 = vmul.f32 1.442695, %v2183_v18  ;;  %v2181_v26 = vmin.f32 %v4330_v19, 0.0  ;;  %v4334_v28 = vadd.f32 %v4319_v51, %v2007_v20  ;;  %v2343_v22 = vld [vmem:[%s4227_s7 + $0x30] sm:$0xff] }
 0x243   : > { %v3701_v27 = vpop.eup %3700  ;;  %v1999_v29 = vadd.f32 %v1998_v23, %v1789_v21  ;;  %vm2149_vm5 = vcmp.gt.f32.partialorder %v4330_v19, 0.0 }
 0x244   : > { %v2864_v30 = vadd.f32 -1.0, %v3701_v27  ;;  %3706 = vpow2.f32 %v2221_v25  ;;  %v2217_v31 = vmul.f32 1.442695, %v2181_v26  ;;  %v2307_v34 = vsel %vm2147_vm0, %v2115_v55, %v2866_v24  ;;  %v2344_v24 = vld [vmem:[%s4227_s7 + $0x38] sm:$0xff] }
 0x245   : > { %v3703_v33 = vpop.eup %3702  ;;  %v2184_v36 = vmin.f32 %v4334_v28, 0.0  ;;  %v4339_v37 = vadd.f32 %v4319_v51, %v1999_v29  ;;  %v2371_v43 = vmul.f32 %v2339_v35, %v2307_v34  ;;  %v2341_v29 = vld [vmem:[%s4227_s7 + $0x20] sm:$0xff]  ;;  %vm2152_vm6 = vcmp.gt.f32.partialorder %v4334_v28, 0.0 }
 0x246   : > { %v2867_v38 = vadd.f32 -1.0, %v3703_v33  ;;  %3708 = vpow2.f32 %v2217_v31  ;;  %v2305_v44 = vsel %vm2145_vm1, %v2113_v59, %v2864_v30  ;;  %v1818_v31 = vpop.f32.mrf.mxu0 }
 0x247   : > { %v2223_v40 = vmul.f32 1.442695, %v2184_v36  ;;  %v2182_v41 = vmin.f32 %v4339_v37, 0.0  ;;  %v3705_v42 = vpop.eup %3704  ;;  %v2369_v56 = vmul.f32 %v2337_v47, %v2305_v44  ;;  %vm2150_vm7 = vcmp.gt.f32.partialorder %v4339_v37, 0.0 }
 0x248   : > { %v2308_v45 = vsel %vm2148_vm2, %v2116_v1, %v2867_v38  ;;  %v2865_v49 = vadd.f32 -1.0, %v3705_v42 }
 0x249   : > { %v2372_v48 = vmul.f32 %v2340_v39, %v2308_v45  ;;  %3710 = vpow2.f32 %v2223_v40  ;;  %v2219_v52 = vmul.f32 1.442695, %v2182_v41 }
 0x24a   : > { %v2306_v54 = vsel %vm2146_vm3, %v2114_v6, %v2865_v49 }
 0x24b   : > { %v2977_v53 = vpack.c.bf16 %v2372_v48, %v2371_v43  ;;  %3712 = vpow2.f32 %v2219_v52  ;;  %v3410_v55 = vpop.f32.mrf.mxu1  ;;  %v2370_v57 = vmul.f32 %v2338_v50, %v2306_v54  ;;  %v3367_v43 = vpop.f32.mrf.mxu0 }
 0x24c   : > { %v2020_v58 = vadd.f32 %v3410_v55, %v3362_v32 }
 0x24d   : > { %3049 = vst [vmem:[%s4346_s18 + $0x8] sm:$0xff] %v2977_v53   ;;  %v2011_v59 = vpop.f32.mrf.mxu1  ;;  %v2972_v61 = vpack.c.bf16 %v2370_v57, %v2369_v56  ;;  %v1821_v50 = vpop.f32.mrf.mxu0 }
 0x24e   : > { %v4350_v62 = vadd.f32 %v4319_v51, %v2020_v58  ;;  %v2012_v63 = vadd.f32 %v2011_v59, %v1802_v46 }
 0x24f   : > { %v3411_v0 = vpop.f32.mrf.mxu1  ;;  %2973 = vst [vmem:[%s4346_s18] sm:$0xff] %v2972_v61   ;;  %v3370_v61 = vpop.f32.mrf.mxu0 }
 0x250   : > { %v2187_v1 = vmin.f32 %v4350_v62, 0.0  ;;  %v4355_v2 = vadd.f32 %v4319_v51, %v2012_v63  ;;  %v2023_v3 = vadd.f32 %v3411_v0, %v3363_v60  ;;  %vm2155_vm8 = vcmp.gt.f32.partialorder %v4350_v62, 0.0 }
 0x251   : > { %v3707_v5 = vpop.eup %3706  ;;  %v2014_v6 = vpop.f32.mrf.mxu1 }
 0x252   : > { %v2229_v7 = vmul.f32 1.442695, %v2187_v1  ;;  %v2185_v8 = vmin.f32 %v4355_v2, 0.0  ;;  %v2870_v10 = vadd.f32 -1.0, %v3707_v5  ;;  %v4359_v11 = vadd.f32 %v4319_v51, %v2023_v3 }
 0x253   : > { %v3709_v9 = vpop.eup %3708  ;;  %v2015_v12 = vadd.f32 %v2014_v6, %v1805_v4  ;;  %v2347_v4 = vld [vmem:[%s4227_s7 + $0x50] sm:$0xff]  ;;  %vm2153_vm10 = vcmp.gt.f32.partialorder %v4355_v2, 0.0 }
 0x254   : > { %v2868_v13 = vadd.f32 -1.0, %v3709_v9  ;;  %3714 = vpow2.f32 %v2229_v7  ;;  %v2225_v14 = vmul.f32 1.442695, %v2185_v8  ;;  %v2188_v17 = vmin.f32 %v4359_v11, 0.0  ;;  %v2348_v7 = vld [vmem:[%s4227_s7 + $0x58] sm:$0xff] }
 0x255   : > { %v4363_v18 = vadd.f32 %v4319_v51, %v2015_v12  ;;  %v2311_v21 = vsel %vm2151_vm4, %v4326_v15, %v2870_v10  ;;  %v2342_v15 = vld [vmem:[%s4227_s7 + $0x28] sm:$0xff]  ;;  %vm2156_vm9 = vcmp.gt.f32.partialorder %v4359_v11, 0.0  ;;  %v1834_v10 = vpop.f32.mrf.mxu0 }
 0x256   : > { %v3711_v20 = vpop.eup %3710  ;;  %3716 = vpow2.f32 %v2225_v14  ;;  %v2231_v25 = vmul.f32 1.442695, %v2188_v17  ;;  %v2309_v27 = vsel %vm2149_vm5, %v4330_v19, %v2868_v13  ;;  %v2375_v34 = vmul.f32 %v2343_v22, %v2311_v21  ;;  %v2346_v21 = vld [vmem:[%s4227_s7 + $0x48] sm:$0xff] }
 0x257   : > { %v2871_v23 = vadd.f32 -1.0, %v3711_v20  ;;  %v2186_v30 = vmin.f32 %v4363_v18, 0.0  ;;  %v2373_v38 = vmul.f32 %v2341_v29, %v2309_v27  ;;  %vm2154_vm11 = vcmp.gt.f32.partialorder %v4363_v18, 0.0  ;;  %v3371_v27 = vpop.f32.mrf.mxu0 }
 0x258   : > { %v3713_v26 = vpop.eup %3712  ;;  %3718 = vpow2.f32 %v2231_v25 }
 0x259   : > { %v2312_v32 = vsel %vm2152_vm6, %v4334_v28, %v2871_v23  ;;  %v2869_v33 = vadd.f32 -1.0, %v3713_v26  ;;  %v2227_v36 = vmul.f32 1.442695, %v2186_v30 }
 0x25a   : > { %v2376_v35 = vmul.f32 %v2344_v24, %v2312_v32 }
 0x25b   : > { %v2310_v19 = vsel %vm2150_vm7, %v4339_v37, %v2869_v33  ;;  %v3414_v39 = vpop.f32.mrf.mxu1  ;;  %3720 = vpow2.f32 %v2227_v36 }
 0x25c   : > { %v2987_v40 = vpack.c.bf16 %v2376_v35, %v2375_v34  ;;  %v2374_v41 = vmul.f32 %v2342_v15, %v2310_v19  ;;  %v2036_v42 = vadd.f32 %v3414_v39, %v3366_v16  ;;  %v2345_v16 = vld [vmem:[%s4227_s7 + $0x40] sm:$0xff]  ;;  %v1837_v35 = vpop.f32.mrf.mxu0 }
 0x25d   : > { %v2027_v28 = vpop.f32.mrf.mxu1 }
 0x25e   : > { %3051 = vst [vmem:[%s4346_s18 + $0x18] sm:$0xff] %v2987_v40   ;;  %v2982_v44 = vpack.c.bf16 %v2374_v41, %v2373_v38  ;;  %v4380_v45 = vadd.f32 %v4319_v51, %v2036_v42  ;;  %v2028_v46 = vadd.f32 %v2027_v28, %v1818_v31 }
 0x25f   : > { %v3415_v47 = vpop.f32.mrf.mxu1 }
 0x260   : > { %3050 = vst [vmem:[%s4346_s18 + $0x10] sm:$0xff] %v2982_v44   ;;  %v2191_v48 = vmin.f32 %v4380_v45, 0.0  ;;  %v4385_v49 = vadd.f32 %v4319_v51, %v2028_v46  ;;  %v2039_v37 = vadd.f32 %v3415_v47, %v3367_v43  ;;  %v3374_v44 = vpop.f32.mrf.mxu0  ;;  %vm2159_vm12 = vcmp.gt.f32.partialorder %v4380_v45, 0.0 }
 0x261   : > { %v3715_v52 = vpop.eup %3714  ;;  %v2030_v53 = vpop.f32.mrf.mxu1 }
 0x262   : > { %v2874_v54 = vadd.f32 -1.0, %v3715_v52  ;;  %v2237_v55 = vmul.f32 1.442695, %v2191_v48  ;;  %v2189_v56 = vmin.f32 %v4385_v49, 0.0  ;;  %v4389_v58 = vadd.f32 %v4319_v51, %v2039_v37 }
 0x263   : > { %v3717_v57 = vpop.eup %3716  ;;  %v2031_v60 = vadd.f32 %v2030_v53, %v1821_v50  ;;  %v2351_v50 = vld [vmem:[%s4227_s7 + $0x70] sm:$0xff]  ;;  %vm2157_vm14 = vcmp.gt.f32.partialorder %v4385_v49, 0.0 }
 0x264   : > { %3722 = vpow2.f32 %v2237_v55  ;;  %v2233_v59 = vmul.f32 1.442695, %v2189_v56  ;;  %v2192_v63 = vmin.f32 %v4389_v58, 0.0  ;;  %v2315_v3 = vsel %vm2155_vm8, %v4350_v62, %v2874_v54  ;;  %v2352_v54 = vld [vmem:[%s4227_s7 + $0x78] sm:$0xff] }
 0x265   : > { %v4394_v0 = vadd.f32 %v4319_v51, %v2031_v60  ;;  %v3719_v1 = vpop.eup %3718  ;;  %v2872_v5 = vadd.f32 -1.0, %v3717_v57  ;;  %v2379_v13 = vmul.f32 %v2347_v4, %v2315_v3  ;;  %vm2160_vm13 = vcmp.gt.f32.partialorder %v4389_v58, 0.0  ;;  %v1850_v57 = vpop.f32.mrf.mxu0  ;;  %v2350_v4 = vld [vmem:[%s4227_s7 + $0x68] sm:$0xff] }
 0x266   : > { %3724 = vpow2.f32 %v2233_v59  ;;  %v2875_v6 = vadd.f32 -1.0, %v3719_v1  ;;  %v2239_v8 = vmul.f32 1.442695, %v2192_v63  ;;  %v2349_v63 = vld [vmem:[%s4227_s7 + $0x60] sm:$0xff] }
 0x267   : > { %v2190_v9 = vmin.f32 %v4394_v0, 0.0  ;;  %v2313_v62 = vsel %vm2153_vm10, %v4355_v2, %v2872_v5  ;;  %vm2158_vm15 = vcmp.gt.f32.partialorder %v4394_v0, 0.0 }
 0x268   : > { %v3721_v12 = vpop.eup %3720  ;;  %v2316_v14 = vsel %vm2156_vm9, %v4359_v11, %v2875_v6  ;;  %3726 = vpow2.f32 %v2239_v8  ;;  %v2377_v11 = vmul.f32 %v2345_v16, %v2313_v62 }
 0x269   : > { %v2380_v17 = vmul.f32 %v2348_v7, %v2316_v14  ;;  %v2873_v20 = vadd.f32 -1.0, %v3721_v12  ;;  %v2235_v22 = vmul.f32 1.442695, %v2190_v9 }
 0x26b   : > { %v3418_v23 = vpop.f32.mrf.mxu1  ;;  %v2997_v24 = vpack.c.bf16 %v2380_v17, %v2379_v13  ;;  %v2314_v25 = vsel %vm2154_vm11, %v4363_v18, %v2873_v20  ;;  %3728 = vpow2.f32 %v2235_v22 }
 0x26c   : > { %v2052_v26 = vadd.f32 %v3418_v23, %v3370_v61  ;;  %v2378_v29 = vmul.f32 %v2346_v21, %v2314_v25 }
 0x26d   : > { %v2043_v30 = vpop.f32.mrf.mxu1  ;;  %3053 = vst [vmem:[%s4346_s18 + $0x28] sm:$0xff] %v2997_v24  }
 0x26e   : > { %v4410_v2 = vadd.f32 %v4319_v51, %v2052_v26  ;;  %v2044_v31 = vadd.f32 %v2043_v30, %v1834_v10  ;;  %v2992_v32 = vpack.c.bf16 %v2378_v29, %v2377_v11  ;;  %v3375_v10 = vpop.f32.mrf.mxu0 }
 0x26f   : > { %v3419_v33 = vpop.f32.mrf.mxu1 }
 0x270   : > { %v2195_v15 = vmin.f32 %v4410_v2, 0.0  ;;  %v4414_v34 = vadd.f32 %v4319_v51, %v2044_v31  ;;  %v2055_v18 = vadd.f32 %v3419_v33, %v3371_v27  ;;  %3052 = vst [vmem:[%s4346_s18 + $0x20] sm:$0xff] %v2992_v32   ;;  %v1853_v21 = vpop.f32.mrf.mxu0  ;;  %vm2163_vm0 = vcmp.gt.f32.partialorder %v4410_v2, 0.0 }
 0x271   : > { %v3723_v36 = vpop.eup %3722  ;;  %v2046_v38 = vpop.f32.mrf.mxu1 }
 0x272   : > { %v2878_v19 = vadd.f32 -1.0, %v3723_v36  ;;  %v2245_v39 = vmul.f32 1.442695, %v2195_v15  ;;  %v2193_v40 = vmin.f32 %v4414_v34, 0.0  ;;  %v4419_v42 = vadd.f32 %v4319_v51, %v2055_v18  ;;  %v3378_v31 = vpop.f32.mrf.mxu0 }
 0x273   : > { %v3725_v41 = vpop.eup %3724  ;;  %v2047_v43 = vadd.f32 %v2046_v38, %v1837_v35  ;;  %v2355_v35 = vld [vmem:[%s4227_s7 + $0x90] sm:$0xff]  ;;  %vm2161_vm2 = vcmp.gt.f32.partialorder %v4414_v34, 0.0 }
 0x274   : > { %3730 = vpow2.f32 %v2245_v39  ;;  %v2241_v28 = vmul.f32 1.442695, %v2193_v40  ;;  %v2196_v46 = vmin.f32 %v4419_v42, 0.0  ;;  %v2319_v37 = vsel %vm2159_vm12, %v4380_v45, %v2878_v19  ;;  %v2356_v19 = vld [vmem:[%s4227_s7 + $0x98] sm:$0xff] }
 0x275   : > { %v4424_v47 = vadd.f32 %v4319_v51, %v2047_v43  ;;  %v3727_v48 = vpop.eup %3726  ;;  %v2876_v52 = vadd.f32 -1.0, %v3725_v41  ;;  %v2383_v59 = vmul.f32 %v2351_v50, %v2319_v37  ;;  %vm2164_vm1 = vcmp.gt.f32.partialorder %v4419_v42, 0.0  ;;  %v1866_v41 = vpop.f32.mrf.mxu0  ;;  %v2354_v50 = vld [vmem:[%s4227_s7 + $0x88] sm:$0xff] }
 0x276   : > { %3732 = vpow2.f32 %v2241_v28  ;;  %v2879_v53 = vadd.f32 -1.0, %v3727_v48  ;;  %v2247_v55 = vmul.f32 1.442695, %v2196_v46  ;;  %v2353_v46 = vld [vmem:[%s4227_s7 + $0x80] sm:$0xff] }
 0x277   : > { %v2194_v56 = vmin.f32 %v4424_v47, 0.0  ;;  %v2317_v45 = vsel %vm2157_vm14, %v4385_v49, %v2876_v52  ;;  %vm2162_vm3 = vcmp.gt.f32.partialorder %v4424_v47, 0.0 }
 0x278   : > { %v3729_v60 = vpop.eup %3728  ;;  %v2320_v61 = vsel %vm2160_vm13, %v4389_v58, %v2879_v53  ;;  %3734 = vpow2.f32 %v2247_v55  ;;  %v2381_v58 = vmul.f32 %v2349_v63, %v2317_v45 }
 0x279   : > { %v2384_v1 = vmul.f32 %v2352_v54, %v2320_v61  ;;  %v2877_v3 = vadd.f32 -1.0, %v3729_v60  ;;  %v2243_v5 = vmul.f32 1.442695, %v2194_v56 }
 0x27b   : > { %v3422_v6 = vpop.f32.mrf.mxu1  ;;  %v3007_v7 = vpack.c.bf16 %v2384_v1, %v2383_v59  ;;  %v2318_v8 = vsel %vm2158_vm15, %v4394_v0, %v2877_v3  ;;  %3736 = vpow2.f32 %v2243_v5 }
 0x27c   : > { %v2068_v9 = vadd.f32 %v3422_v6, %v3374_v44  ;;  %v2382_v12 = vmul.f32 %v2350_v4, %v2318_v8 }
 0x27d   : > { %v2059_v13 = vpop.f32.mrf.mxu1  ;;  %3055 = vst [vmem:[%s4346_s18 + $0x38] sm:$0xff] %v3007_v7  }
 0x27e   : > { %v4440_v49 = vadd.f32 %v4319_v51, %v2068_v9  ;;  %v2060_v14 = vadd.f32 %v2059_v13, %v1850_v57  ;;  %v3002_v62 = vpack.c.bf16 %v2382_v12, %v2381_v58  ;;  %v3379_v57 = vpop.f32.mrf.mxu0 }
 0x27f   : > { %v3423_v16 = vpop.f32.mrf.mxu1 }
 0x280   : > { %v2199_v17 = vmin.f32 %v4440_v49, 0.0  ;;  %v4444_v20 = vadd.f32 %v4319_v51, %v2060_v14  ;;  %v2071_v0 = vadd.f32 %v3423_v16, %v3375_v10  ;;  %3054 = vst [vmem:[%s4346_s18 + $0x30] sm:$0xff] %v3002_v62   ;;  %v1869_v4 = vpop.f32.mrf.mxu0  ;;  %vm2167_vm4 = vcmp.gt.f32.partialorder %v4440_v49, 0.0 }
 0x281   : > { %v3731_v22 = vpop.eup %3730  ;;  %v2062_v23 = vpop.f32.mrf.mxu1 }
 0x282   : > { %v2882_v24 = vadd.f32 -1.0, %v3731_v22  ;;  %v2253_v25 = vmul.f32 1.442695, %v2199_v17  ;;  %v2197_v26 = vmin.f32 %v4444_v20, 0.0  ;;  %v4449_v11 = vadd.f32 %v4319_v51, %v2071_v0  ;;  %v2359_v0 = vld [vmem:[%s4227_s7 + $0xb0] sm:$0xff]  ;;  %v3382_v22 = vpop.f32.mrf.mxu0 }
 0x283   : > { %v3733_v27 = vpop.eup %3732  ;;  %v2063_v29 = vadd.f32 %v2062_v23, %v1853_v21  ;;  %vm2165_vm6 = vcmp.gt.f32.partialorder %v4444_v20, 0.0 }
 0x284   : > { %3738 = vpow2.f32 %v2253_v25  ;;  %v2249_v30 = vmul.f32 1.442695, %v2197_v26  ;;  %v2200_v32 = vmin.f32 %v4449_v11, 0.0  ;;  %v2323_v18 = vsel %vm2163_vm0, %v4410_v2, %v2882_v24  ;;  %v2360_v24 = vld [vmem:[%s4227_s7 + $0xb8] sm:$0xff] }
 0x285   : > { %v4454_v33 = vadd.f32 %v4319_v51, %v2063_v29  ;;  %v3735_v15 = vpop.eup %3734  ;;  %v2880_v36 = vadd.f32 -1.0, %v3733_v27  ;;  %v2387_v28 = vmul.f32 %v2355_v35, %v2323_v18  ;;  %vm2168_vm5 = vcmp.gt.f32.partialorder %v4449_v11, 0.0  ;;  %v2358_v18 = vld [vmem:[%s4227_s7 + $0xa8] sm:$0xff] }
 0x286   : > { %3740 = vpow2.f32 %v2249_v30  ;;  %v2883_v38 = vadd.f32 -1.0, %v3735_v15  ;;  %v2255_v39 = vmul.f32 1.442695, %v2200_v32 }
 0x287   : > { %v2198_v40 = vmin.f32 %v4454_v33, 0.0  ;;  %v2321_v2 = vsel %vm2161_vm2, %v4414_v34, %v2880_v36  ;;  %v1882_v36 = vpop.f32.mrf.mxu0  ;;  %vm2166_vm7 = vcmp.gt.f32.partialorder %v4454_v33, 0.0 }
 0x288   : > { %v3737_v43 = vpop.eup %3736  ;;  %v2324_v44 = vsel %vm2164_vm1, %v4419_v42, %v2883_v38  ;;  %3742 = vpow2.f32 %v2255_v39  ;;  %v2385_v42 = vmul.f32 %v2353_v46, %v2321_v2 }
 0x289   : > { %v2388_v48 = vmul.f32 %v2356_v19, %v2324_v44  ;;  %v2881_v37 = vadd.f32 -1.0, %v3737_v43  ;;  %v2251_v52 = vmul.f32 1.442695, %v2198_v40 }
 0x28b   : > { %v3426_v53 = vpop.f32.mrf.mxu1  ;;  %v3017_v54 = vpack.c.bf16 %v2388_v48, %v2387_v28  ;;  %v2322_v55 = vsel %vm2162_vm3, %v4424_v47, %v2881_v37  ;;  %3744 = vpow2.f32 %v2251_v52 }
 0x28c   : > { %v2084_v56 = vadd.f32 %v3426_v53, %v3378_v31  ;;  %v2386_v60 = vmul.f32 %v2354_v50, %v2322_v55  ;;  %v2357_v31 = vld [vmem:[%s4227_s7 + $0xa0] sm:$0xff] }
 0x28d   : > { %v2075_v59 = vpop.f32.mrf.mxu1  ;;  %3057 = vst [vmem:[%s4346_s18 + $0x48] sm:$0xff] %v3017_v54  }
 0x28e   : > { %v4470_v34 = vadd.f32 %v4319_v51, %v2084_v56  ;;  %v2076_v61 = vadd.f32 %v2075_v59, %v1866_v41  ;;  %v3012_v45 = vpack.c.bf16 %v2386_v60, %v2385_v42 }
 0x28f   : > { %v3427_v63 = vpop.f32.mrf.mxu1 }
 0x290   : > { %v2203_v1 = vmin.f32 %v4470_v34, 0.0  ;;  %v4474_v3 = vadd.f32 %v4319_v51, %v2076_v61  ;;  %v2087_v47 = vadd.f32 %v3427_v63, %v3379_v57  ;;  %3056 = vst [vmem:[%s4346_s18 + $0x40] sm:$0xff] %v3012_v45   ;;  %vm2171_vm8 = vcmp.gt.f32.partialorder %v4470_v34, 0.0 }
 0x291   : > { %v3739_v5 = vpop.eup %3738  ;;  %v2078_v6 = vpop.f32.mrf.mxu1 }
 0x292   : > { %v2886_v7 = vadd.f32 -1.0, %v3739_v5  ;;  %v2261_v8 = vmul.f32 1.442695, %v2203_v1  ;;  %v2201_v9 = vmin.f32 %v4474_v3, 0.0  ;;  %v4479_v58 = vadd.f32 %v4319_v51, %v2087_v47  ;;  %v2363_v47 = vld [vmem:[%s4227_s7 + $0xd0] sm:$0xff] }
 0x293   : > { %v3741_v10 = vpop.eup %3740  ;;  %v2079_v12 = vadd.f32 %v2078_v6, %v1869_v4  ;;  %v2364_v6 = vld [vmem:[%s4227_s7 + $0xd8] sm:$0xff]  ;;  %vm2169_vm10 = vcmp.gt.f32.partialorder %v4474_v3, 0.0 }
 0x294   : > { %3746 = vpow2.f32 %v2261_v8  ;;  %v2257_v13 = vmul.f32 1.442695, %v2201_v9  ;;  %v2204_v14 = vmin.f32 %v4479_v58, 0.0  ;;  %v2327_v17 = vsel %vm2167_vm4, %v4440_v49, %v2886_v7 }
 0x295   : > { %v4484_v62 = vadd.f32 %v4319_v51, %v2079_v12  ;;  %v3743_v16 = vpop.eup %3742  ;;  %v2884_v21 = vadd.f32 -1.0, %v3741_v10  ;;  %v2391_v29 = vmul.f32 %v2359_v0, %v2327_v17  ;;  %vm2172_vm9 = vcmp.gt.f32.partialorder %v4479_v58, 0.0  ;;  %v2361_v12 = vld [vmem:[%s4227_s7 + $0xc0] sm:$0xff] }
 0x296   : > { %3748 = vpow2.f32 %v2257_v13  ;;  %v2887_v23 = vadd.f32 -1.0, %v3743_v16  ;;  %v2263_v25 = vmul.f32 1.442695, %v2204_v14  ;;  %v2362_v16 = vld [vmem:[%s4227_s7 + $0xc8] sm:$0xff] }
 0x297   : > { %v2202_v26 = vmin.f32 %v4484_v62, 0.0  ;;  %v2325_v49 = vsel %vm2165_vm6, %v4444_v20, %v2884_v21  ;;  %v3383_v20 = vpop.f32.mrf.mxu0  ;;  %vm2170_vm11 = vcmp.gt.f32.partialorder %v4484_v62, 0.0 }
 0x298   : > { %v3745_v27 = vpop.eup %3744  ;;  %v2328_v30 = vsel %vm2168_vm5, %v4449_v11, %v2887_v23  ;;  %3750 = vpow2.f32 %v2263_v25  ;;  %v2389_v11 = vmul.f32 %v2357_v31, %v2325_v49  ;;  %v2368_v49 = vld [vmem:[%s4227_s7 + $0xf8] sm:$0xff] }
 0x299   : > { %v2392_v32 = vmul.f32 %v2360_v24, %v2328_v30  ;;  %v2885_v15 = vadd.f32 -1.0, %v3745_v27  ;;  %v2259_v35 = vmul.f32 1.442695, %v2202_v26  ;;  %v1885_v54 = vpop.f32.mrf.mxu0  ;;  %v2367_v30 = vld [vmem:[%s4227_s7 + $0xf0] sm:$0xff] }
 0x29b   : > { %v3430_v38 = vpop.f32.mrf.mxu1  ;;  %v3027_v19 = vpack.c.bf16 %v2392_v32, %v2391_v29  ;;  %v2326_v39 = vsel %vm2166_vm7, %v4454_v33, %v2885_v15  ;;  %3752 = vpow2.f32 %v2259_v35  ;;  %v2365_v35 = vld [vmem:[%s4227_s7 + $0xe0] sm:$0xff] }
 0x29c   : > { %v2100_v40 = vadd.f32 %v3430_v38, %v3382_v22  ;;  %v2390_v41 = vmul.f32 %v2358_v18, %v2326_v39 }
 0x29d   : > { %v2091_v43 = vpop.f32.mrf.mxu1  ;;  %3059 = vst [vmem:[%s4346_s18 + $0x58] sm:$0xff] %v3027_v19   ;;  %v2366_v19 = vld [vmem:[%s4227_s7 + $0xe8] sm:$0xff] }
 0x29e   : > { %v2143_v28 = vadd.f32 %v4319_v51, %v2100_v40  ;;  %v2092_v44 = vadd.f32 %v2091_v43, %v1882_v36  ;;  %v3022_v2 = vpack.c.bf16 %v2390_v41, %v2389_v11 }
 0x29f   : > { %v3431_v46 = vpop.f32.mrf.mxu1 }
 0x2a0   : > { %v2207_v48 = vmin.f32 %v2143_v28, 0.0  ;;  %v4501_v37 = vadd.f32 %v4319_v51, %v2092_v44  ;;  %v2103_v50 = vadd.f32 %v3431_v46, %v3383_v20  ;;  %3058 = vst [vmem:[%s4346_s18 + $0x50] sm:$0xff] %v3022_v2   ;;  %vm2175_vm12 = vcmp.gt.f32.partialorder %v2143_v28, 0.0 }
 0x2a1   : > { %v3747_v52 = vpop.eup %3746  ;;  %v2094_v33 = vpop.f32.mrf.mxu1 }
 0x2a2   : > { %v2890_v53 = vadd.f32 -1.0, %v3747_v52  ;;  %v2269_v55 = vmul.f32 1.442695, %v2207_v48  ;;  %v2205_v56 = vmin.f32 %v4501_v37, 0.0  ;;  %v2144_v42 = vadd.f32 %v4319_v51, %v2103_v50 }
 0x2a3   : > { %v3749_v57 = vpop.eup %3748  ;;  %v2095_v60 = vadd.f32 %v2094_v33, %v1885_v54  ;;  %vm2173_vm14 = vcmp.gt.f32.partialorder %v4501_v37, 0.0 }
 0x2a4   : > { %3754 = vpow2.f32 %v2269_v55  ;;  %v2265_v59 = vmul.f32 1.442695, %v2205_v56  ;;  %v2208_v61 = vmin.f32 %v2144_v42, 0.0  ;;  %v2331_v1 = vsel %vm2171_vm8, %v4470_v34, %v2890_v53 }
 0x2a5   : > { %v2142_v45 = vadd.f32 %v4319_v51, %v2095_v60  ;;  %v3751_v63 = vpop.eup %3750  ;;  %v2888_v4 = vadd.f32 -1.0, %v3749_v57  ;;  %v2395_v10 = vmul.f32 %v2363_v47, %v2331_v1  ;;  %vm2176_vm13 = vcmp.gt.f32.partialorder %v2144_v42, 0.0 }
 0x2a6   : > { %3756 = vpow2.f32 %v2265_v59  ;;  %v2891_v5 = vadd.f32 -1.0, %v3751_v63  ;;  %v2271_v7 = vmul.f32 1.442695, %v2208_v61 }
 0x2a7   : > { %v2206_v8 = vmin.f32 %v2142_v45, 0.0  ;;  %v2329_v34 = vsel %vm2169_vm10, %v4474_v3, %v2888_v4  ;;  %vm2174_vm15 = vcmp.gt.f32.partialorder %v2142_v45, 0.0 }
 0x2a8   : > { %v3753_v9 = vpop.eup %3752  ;;  %v2332_v51 = vsel %vm2172_vm9, %v4479_v58, %v2891_v5  ;;  %3758 = vpow2.f32 %v2271_v7  ;;  %v2393_v22 = vmul.f32 %v2361_v12, %v2329_v34 }
 0x2a9   : > { %v2396_v13 = vmul.f32 %v2364_v6, %v2332_v51  ;;  %v2889_v14 = vadd.f32 -1.0, %v3753_v9  ;;  %v2267_v17 = vmul.f32 1.442695, %v2206_v8 }
 0x2ab   : > { %v3037_v0 = vpack.c.bf16 %v2396_v13, %v2395_v10  ;;  %v2330_v21 = vsel %vm2170_vm11, %v4484_v62, %v2889_v14  ;;  %3760 = vpow2.f32 %v2267_v17 }
 0x2ac   : > { %v2394_v23 = vmul.f32 %v2362_v16, %v2330_v21 }
 0x2ad   : > { %3061 = vst [vmem:[%s4346_s18 + $0x68] sm:$0xff] %v3037_v0  }
 0x2ae   : > { %v3032_v58 = vpack.c.bf16 %v2394_v23, %v2393_v22 }
 0x2b0   : > { %3060 = vst [vmem:[%s4346_s18 + $0x60] sm:$0xff] %v3032_v58  }
 0x2b1   : > { %v3755_v24 = vpop.eup %3754 }
 0x2b2   : > { %v2894_v25 = vadd.f32 -1.0, %v3755_v24 }
 0x2b3   : > { %v3757_v3 = vpop.eup %3756 }
 0x2b4   : > { %v2892_v27 = vadd.f32 -1.0, %v3757_v3  ;;  %v2335_v29 = vsel %vm2175_vm12, %v2143_v28, %v2894_v25 }
 0x2b5   : > { %v3759_v26 = vpop.eup %3758  ;;  %v2399_v15 = vmul.f32 %v2367_v30, %v2335_v29 }
 0x2b6   : > { %v2895_v62 = vadd.f32 -1.0, %v3759_v26  ;;  %v2333_v18 = vsel %vm2173_vm14, %v4501_v37, %v2892_v27 }
 0x2b7   : > { %v2397_v11 = vmul.f32 %v2365_v35, %v2333_v18 }
 0x2b8   : > { %v3761_v31 = vpop.eup %3760  ;;  %v2336_v32 = vsel %vm2176_vm13, %v2144_v42, %v2895_v62 }
 0x2b9   : > { %v2400_v36 = vmul.f32 %v2368_v49, %v2336_v32  ;;  %v2893_v38 = vadd.f32 -1.0, %v3761_v31 }
 0x2bb   : > { %v3047_v39 = vpack.c.bf16 %v2400_v36, %v2399_v15  ;;  %v2334_v40 = vsel %vm2174_vm15, %v2142_v45, %v2893_v38 }
 0x2bc   : > { %v2398_v41 = vmul.f32 %v2366_v19, %v2334_v40 }
 0x2bd   : > { %3063 = vst [vmem:[%s4346_s18 + $0x78] sm:$0xff] %v3047_v39  }
 0x2be   : > { %v3042_v43 = vpack.c.bf16 %v2398_v41, %v2397_v11 }
 0x2c0   : > { %3062 = vst [vmem:[%s4346_s18 + $0x70] sm:$0xff] %v3042_v43  }
 0x2c1   : > { %3909 = shalt.err (!%p3906_p13)
}
 0x2c2   : > { %s3910_s7 = scalar_lea.hbm %s4533_s14, 2048  ;;  %s3914_s11 = scalar_lea.hbm %s4590_s6, 4096 }
 0x2c3   : > { %p3911_p5 = scmp.ne.s32.totalorder %s4533_s14, %s3910_s7  ;;  %p3915_p2 = scmp.lt.s32.totalorder %s4533_s14, %s4590_s6 }
 0x2c4   : > { %p3916_p9 = scmp.lt.s32.totalorder %s3914_s11, %s3910_s7 }
 0x2c5   : > { %p3912_p11 = pnand %p3911_p5, %p4128_p3 }
 0x2c6   : > { %p3917_p4 = por %p3916_p9, %p3915_p2 }
 0x2c7   : > { %p3913_p8 = pneg %p3912_p11 }
 0x2c9   : > { %p3918_p10 = pnand %p3917_p4, %p3913_p8 }
 0x2cb   : > { %3921 = shalt.err (!%p3918_p10)
}
 0x2cc   : > { %s4002_s8 = smov 64   ;;  %s4003_s17 = smov 4  }
 0x2cd   : > { %3448 = dma.vmem_to_hbm [thread:$0]  (%p4128_p3), %s4535_s10, 2048, %s4533_s14, %s2562_s16, %s4002_s8, %s4002_s8, %s4003_s17  }
 0x2ce PF: > { %s4625_s18 = sld [smem:[#allocation18_spill]]  ;;  %p4627_p1 = scmp.ge.s32.totalorder %s3988_s26, 2 }
 0x2d0   : > { %p3468_p12 = pnand %p4627_p1, %p4084_p6 }
 0x2d2   : > { %p3469_p0 = pneg %p3468_p12 }
 0x2d4   : > { %s2590_s15 = sand.u32 1, %s4625_s18  }
 0x2d5   : > { %s2591_s30 = scalar_lea.sflag [#allocation5], %s2590_s15 }
 0x2d6   : > { %3963 = dma.done.wait (%p3469_p0), %s2591_s30, 2048  }
 0x2d7   : > { %3965 = vsyncadd (%p3469_p0), %s2591_s30, 4294965248  ;;  %s24_s26 = sadd.s32 1, %s3988_s26   ;;  %s4628_s19 = sld [smem:[#allocation20_spill]] }
 0x2d8   : > { %p21_p7 = scmp.ge.s32.totalorder %s24_s26, 4   ;;  %s4629_s21 = smov %s3972_s22 }
 0x2d9   : > { %s4630_s22 = smov %s3976_s23  ;;  %s4631_s23 = smov %s4138_s9 }
 0x2da   : > { %s4632_s24 = smov %s3984_s25  ;;  %23 = sbr.rel (!%p21_p7) target bundleno = 11 (0xb), region = 122 }
 0x2dd   : > { %s4633_s25 = smov %s4628_s19 }
 0x2df   :  { %2596 = vsyncpa [#allocation4], 1 }
 0x2e0   :  { %2598 = vsyncpa [#allocation4 + $0x1], 1 }
 0x2e1   :  { %2599 = vsyncpa [#allocation7], 1 }
 0x2e2   :  { %2600 = vsyncpa [#allocation10], 1 }
 0x2e3   :  { %2601 = vsyncpa [#allocation5], 1 }
 0x2e4   :  { %2603 = vsyncpa [#allocation5 + $0x1], 1 }

</bundles_post_ra>
